<compile_context>
chip_gen: v7x
topology: tpu7x:2x2x1
jax: 0.10.0
libtpu: 0.0.40
codegen_flags: <defaults>
</compile_context>

<pallas_src>
import jax
import jax.numpy as jnp
from jax.experimental import pallas as pl
from jax.experimental.pallas import tpu as pltpu


def _round_up(x, m):
    return pl.cdiv(x, m) * m


def _choose_n_tiling(hidden):
    """Lane-dense N padding + N tile size.

    Single N tile whenever the padded width fits (<= 2048 cols => weight tile
    <= 8 MiB bf16 per buffer), so x is streamed from HBM exactly once.
    Wider projections use tn = 1024 and pad N up to a multiple of it
    (zero columns are free at mem-bound).
    """
    n_pad = _round_up(hidden, 128)
    if n_pad <= 2048:
        return n_pad, n_pad
    tn = 1024
    return _round_up(n_pad, tn), tn


def prepare_feature_projection_params(weight, bias, *, param_dtype=jnp.bfloat16):
    """One-time parameter prep (call once at model init, NOT per forward).

    weight: (hidden, 2048) in PyTorch (out, in) layout; bias: (hidden,).
    Returns w_padded: (2048, n_pad) param_dtype, b_padded: (1, n_pad) f32,
    with n_pad a multiple of 128 so every kernel store is a full-lane vst.
    """
    hidden, in_dim = weight.shape
    n_pad, _ = _choose_n_tiling(hidden)
    w = weight.T.astype(param_dtype)                       # (in_dim, hidden)
    b = bias.astype(jnp.float32).reshape(1, hidden)
    if n_pad != hidden:
        w = jnp.pad(w, ((0, 0), (0, n_pad - hidden)))
        b = jnp.pad(b, ((0, 0), (0, n_pad - hidden)))
    return w, b


def _proj_kernel(x_ref, w_ref, b_ref, o_ref):
    # x_ref: (tm, K) input dtype   w_ref: (K, tn) param dtype (bf16)
    # b_ref: (1, tn) f32           o_ref: (tm, tn) out dtype
    x = x_ref[...].astype(w_ref.dtype)      # cast in-kernel: no HBM pre-pass
    acc = jnp.dot(x, w_ref[...], preferred_element_type=jnp.float32)
    o_ref[...] = (acc + b_ref[...]).astype(o_ref.dtype)


def feature_projection(x, w_padded, b_padded, hidden, *, tm=512, out_dtype=None):
    """x: (..., 2048); w_padded/b_padded from prepare_feature_projection_params."""
    in_dim, n_pad = w_padded.shape
    lead = x.shape[:-1]
    out_dtype = x.dtype if out_dtype is None else jnp.dtype(out_dtype)

    x2d = x.reshape(-1, in_dim)
    M = x2d.shape[0]

    # --- tiling -------------------------------------------------------------
    _, tn = _choose_n_tiling(hidden)
    assert n_pad % tn == 0
    grid_n = n_pad // tn

    # Row tile: large (op is HBM-bound), but not bigger than the rounded-up
    # row count for tiny inputs.
    tm = min(tm, _round_up(M, 128))
    # Megacore guard (v7x has 2 TensorCores): if N has a single tile, M is the
    # only shardable axis -- keep at least two M tiles when M permits.
    if grid_n == 1 and M > 128:
        tm = min(tm, _round_up(pl.cdiv(M, 2), 128))
    grid_m = pl.cdiv(M, tm)            # ragged last M tile handled by Pallas

    # --- VMEM budget (double-buffered) + cost hint ---------------------------
    xb = 2 * tm * in_dim * x2d.dtype.itemsize
    wb = 2 * in_dim * tn * w_padded.dtype.itemsize
    bb = 2 * tn * b_padded.dtype.itemsize
    ob = 2 * tm * tn * out_dtype.itemsize
    vmem_limit = min(int(1.25 * (xb + wb + bb + ob)) + (2 << 20), 56 << 20)

    cost = pl.CostEstimate(
        flops=2 * M * in_dim * n_pad,
        transcendentals=0,
        bytes_accessed=(grid_n * M * in_dim * x2d.dtype.itemsize   # x per N tile
                        + in_dim * n_pad * w_padded.dtype.itemsize  # weights once
                        + n_pad * b_padded.dtype.itemsize
                        + M * n_pad * out_dtype.itemsize))          # output once

    # Grid: N outer, M inner -> weight/bias block index is constant along the
    # inner M axis (re-fetched only when the N tile changes); x streams along M.
    out = pl.pallas_call(
        _proj_kernel,
        out_shape=jax.ShapeDtypeStruct((M, n_pad), out_dtype),
        grid_spec=pltpu.PrefetchScalarGridSpec(
            num_scalar_prefetch=0,
            grid=(grid_n, grid_m),
            in_specs=[
                pl.BlockSpec((tm, in_dim), lambda j, i: (i, 0)),   # x row tile
                pl.BlockSpec((in_dim, tn), lambda j, i: (0, j)),   # weight cols
                pl.BlockSpec((1, tn), lambda j, i: (0, j)),        # bias cols
            ],
            out_specs=pl.BlockSpec((tm, tn), lambda j, i: (i, j)),
        ),
        compiler_params=pltpu.CompilerParams(
            dimension_semantics=("parallel", "parallel"),
            vmem_limit_bytes=vmem_limit,
        ),
        cost_estimate=cost,
    )(x2d, w_padded, b_padded)

    if n_pad != hidden:
        out = out[:, :hidden]
    return out.reshape(*lead, hidden)


if __name__ == "__main__":
    # Small shapes consistent with the module: image region features of dim
    # 2048 projected to hidden_dim.
    batch, seq, in_dim, hidden_dim = 2, 8, 2048, 32

    key = jax.random.PRNGKey(0)
    kx, kw, kb = jax.random.split(key, 3)

    # Deterministic parameter init (matching nn.Linear's uniform bound),
    # PyTorch (out, in) layout.
    bound = 1.0 / (in_dim ** 0.5)
    weight = jax.random.uniform(kw, (hidden_dim, in_dim), jnp.float32,
                                minval=-bound, maxval=bound)
    bias = jax.random.uniform(kb, (hidden_dim,), jnp.float32,
                              minval=-bound, maxval=bound)
    x = jax.random.normal(kx, (batch, seq, in_dim), jnp.float32)

    # One-time parameter prep (hoisted out of the per-call path).
    w_padded, b_padded = prepare_feature_projection_params(weight, bias)

    y = feature_projection(x, w_padded, b_padded, hidden_dim)
    y = jax.block_until_ready(y)

    # Reference check against plain f32 JAX (same math as torch x @ W.T + b).
    # Tolerance loosened: kernel uses bf16 operands with f32 accumulation
    # over K = 2048 (documented numerics contract).
    y_ref = x @ weight.T + bias
    assert y.shape == (batch, seq, hidden_dim)
    assert y.dtype == x.dtype
    assert jnp.allclose(y, y_ref, atol=5e-2, rtol=5e-2), float(
        jnp.max(jnp.abs(y - y_ref)))

    print("KERNEL_OK")
</pallas_src>

<mosaic_0001>
module attributes {stable_mosaic.version = 11 : i64} {
  func.func @_proj_kernel(%arg0: i32, %arg1: i32, %arg2: memref<128x2048xf32, #tpu.memory_space<vmem>>, %arg3: memref<2048x128xbf16, #tpu.memory_space<vmem>>, %arg4: memref<1x128xf32, #tpu.memory_space<vmem>>, %arg5: memref<128x128xf32, #tpu.memory_space<vmem>>) attributes {dimension_semantics = [#tpu.dimension_semantics<parallel>, #tpu.dimension_semantics<parallel>], iteration_bounds = array<i64: 1, 1>, scalar_prefetch = 0 : i64, scratch_operands = 0 : i64, tpu.core_type = #tpu.core_type<tc>, window_params = [{transform_indices = @transform_0, window_bounds = array<i64: 128, 2048>}, {transform_indices = @transform_1, window_bounds = array<i64: 2048, 128>}, {transform_indices = @transform_2, window_bounds = array<i64: 1, 128>}, {transform_indices = @transform_3, window_bounds = array<i64: 128, 128>}]} {
    %c0 = arith.constant 0 : index
    %c0_0 = arith.constant 0 : index
    %0 = vector.load %arg2[%c0, %c0_0] : memref<128x2048xf32, #tpu.memory_space<vmem>>, vector<128x2048xf32>
    %1 = arith.truncf %0 : vector<128x2048xf32> to vector<128x2048xbf16>
    %c0_1 = arith.constant 0 : index
    %c0_2 = arith.constant 0 : index
    %2 = vector.load %arg3[%c0_1, %c0_2] : memref<2048x128xbf16, #tpu.memory_space<vmem>>, vector<2048x128xbf16>
    %cst = arith.constant dense<0.000000e+00> : vector<128x128xf32>
    %3 = tpu.matmul %1, %2, %cst {dimension_numbers = #tpu.dot_dimension_numbers<[1], [0], [0], [1], [0, 0, 1, 1], [], []>} : vector<128x2048xbf16>, vector<2048x128xbf16>, vector<128x128xf32> -> vector<128x128xf32>
    %c0_3 = arith.constant 0 : index
    %c0_4 = arith.constant 0 : index
    %4 = vector.load %arg4[%c0_3, %c0_4] : memref<1x128xf32, #tpu.memory_space<vmem>>, vector<1x128xf32>
    %5 = vector.broadcast %4 : vector<1x128xf32> to vector<128x128xf32>
    %6 = arith.addf %3, %5 : vector<128x128xf32>
    %c0_5 = arith.constant 0 : index
    %c0_6 = arith.constant 0 : index
    %7 = vector.load %arg5[%c0_5, %c0_6] : memref<128x128xf32, #tpu.memory_space<vmem>>, vector<128x128xf32>
    tpu.vector_store %arg5[%c0_5, %c0_6], %6 {strides = array<i32>} : memref<128x128xf32, #tpu.memory_space<vmem>>, vector<128x128xf32>,
    return
  }
  func.func @transform_0(%arg0: i32, %arg1: i32) -> (i32, i32) {
    %c0_i32 = arith.constant 0 : i32
    %c0_i32_0 = arith.constant 0 : i32
    return %arg1, %c0_i32 : i32, i32
  }
  func.func @transform_1(%arg0: i32, %arg1: i32) -> (i32, i32) {
    %c0_i32 = arith.constant 0 : i32
    %c0_i32_0 = arith.constant 0 : i32
    return %c0_i32, %arg0 : i32, i32
  }
  func.func @transform_2(%arg0: i32, %arg1: i32) -> (i32, i32) {
    %c0_i32 = arith.constant 0 : i32
    %c0_i32_0 = arith.constant 0 : i32
    return %c0_i32, %arg0 : i32, i32
  }
  func.func @transform_3(%arg0: i32, %arg1: i32) -> (i32, i32) {
    %c0_i32 = arith.constant 0 : i32
    return %arg1, %arg0 : i32, i32
  }
}

</mosaic_0001>

<bundles_post_ra>
// kernel: tpu_custom_call.1
= control target key start
LH: loop header
LB: loop body
LE: loop exit
PB: predicated region body
PF: predicated region fallthrough
CT: control target
= control target key end

     0   :  { %8 = vsyncpa [#allocation3], 0  ;;  %s3350_s0 = inlined_call_operand.hbm [shape: f32[16,2048], index: 0, kind: input, shape index: {}]   ;;  %s3351_s1 = inlined_call_operand.hbm [shape: bf16[2048,128], index: 1, kind: input, shape index: {}]   ;;  %s3352_s2 = inlined_call_operand.vmem [shape: f32[1,128], index: 2, kind: input, shape index: {}]   ;;  %s3353_s3 = inlined_call_operand.hbm [shape: f32[16,128], index: 3, kind: output, shape index: {}]  }
   0x1   :  { %9 = vsyncpa [#allocation6], 0 }
   0x2   :  { %10 = vsyncpa [#allocation4], 0 }
   0x3   :  { %15 = vsyncadd [#allocation3], 28672  ;;  %s3118_s12 = smov [#allocation2]   ;;  %s3046_s16 = scalar_lea.hbm %s3350_s0, 4096 }
   0x4   :  { %s16_s13 = sshll.u32 %s3118_s12, 4  ;;  %p3047_p0 = scmp.ne.s32.totalorder %s3350_s0, %s3046_s16  ;;  %s17_s13 = int_to_ptr.vmem [resolvable:$true] %s16_s13 }
   0x5   :  { %p3050_p1 = scmp.lt.u32.totalorder %s3046_s16, %s3350_s0 }
   0x7   :  { %p3052_p2 = pnand %p3050_p1, %p3047_p0 }
   0x9   :  { %3055 = shalt.err (!%p3052_p2)
}
   0xa   :  { %s3056_s21 = scalar_lea.vmem %s17_s13, 4096  ;;  %s3060_s22 = scalar_lea.vmem %s17_s13, 32768 }
   0xb   :  { %p3057_p3 = scmp.ne.s32.totalorder %s17_s13, %s3056_s21  ;;  %p3061_p4 = scmp.lt.s32.totalorder %s17_s13, %s17_s13 }
   0xc   :  { %p3062_p5 = scmp.lt.s32.totalorder %s3060_s22, %s3056_s21 }
   0xe   :  { %p3063_p6 = por %p3062_p5, %p3061_p4 }
  0x10   :  { %p3064_p7 = pnand %p3063_p6, %p3057_p3 }
  0x12   :  { %3067 = shalt.err (!%p3064_p7)
}
  0x13   :  { %s3119_s23 = smov 2048   ;;  %s3120_s24 = smov 128  }
  0x14   :  { %22 = dma.hbm_to_vmem [thread:$0]  %s3350_s0, 4096, %s17_s13, [#allocation3], %s3119_s23, %s3119_s23, %s3120_s24  }
  0x15   :  { %s3121_s27 = smov [#allocation5]   ;;  %s3068_s4 = scalar_lea.hbm %s3351_s1, 16384 }
  0x16   :  { %s28_s28 = sshll.u32 %s3121_s27, 4  ;;  %p3069_p8 = scmp.ne.s32.totalorder %s3351_s1, %s3068_s4  ;;  %s29_s28 = int_to_ptr.vmem [resolvable:$true] %s28_s28 }
  0x17   :  { %p3072_p9 = scmp.lt.u32.totalorder %s3068_s4, %s3351_s1 }
  0x19   :  { %p3074_p10 = pnand %p3072_p9, %p3069_p8 }
  0x1b   :  { %3077 = shalt.err (!%p3074_p10)
}
  0x1c   :  { %s3078_s9 = scalar_lea.vmem %s29_s28, 16384  ;;  %p3083_p12 = scmp.lt.s32.totalorder %s29_s28, %s29_s28 }
  0x1d   :  { %p3079_p11 = scmp.ne.s32.totalorder %s29_s28, %s3078_s9  ;;  %p3084_p13 = scmp.lt.s32.totalorder %s3078_s9, %s3078_s9 }
  0x1f   :  { %p3085_p0 = por %p3084_p13, %p3083_p12 }
  0x21   :  { %p3086_p1 = pnand %p3085_p0, %p3079_p11 }
  0x23   :  { %3089 = shalt.err (!%p3086_p1)
}
  0x24   :  { %s3122_s0 = smov 64   ;;  %s3123_s10 = smov 4  }
  0x25   :  { %34 = dma.hbm_to_vmem [thread:$0]  %s3351_s1, 16384, %s29_s28, [#allocation6], %s3122_s0, %s3122_s0, %s3123_s10  }
  0x26   :  { %3112 = dma.done.wait [#allocation3], 32768  }
  0x27   :  { %3113 = vsyncadd [#allocation3], 4294934528 }
  0x28   :  { %3114 = dma.done.wait [#allocation6], 16384  }
  0x29   :  { %3115 = vsyncadd [#allocation6], 4294950912  ;;  %v2918_v0 = vld [vmem:[#allocation5 + $0x40] sm:$0xff]   ;;  %v2922_v4 = vld [vmem:[#allocation5 + $0x48] sm:$0xff]  }
  0x2a   :  { %v2919_v1 = vld [vmem:[#allocation5 + $0xc0] sm:$0xff]   ;;  %2398 = vmatprep.subr.bf16.mxu0 %v2918_v0  ;;  %v2923_v5 = vld [vmem:[#allocation5 + $0xc8] sm:$0xff]   ;;  %v2926_v8 = vld [vmem:[#allocation5 + $0x50] sm:$0xff]  }
  0x2b   :  { %v2920_v2 = vld [vmem:[#allocation5] sm:$0xff]   ;;  %2462 = vmatprep.subr.bf16.mxu1 %v2919_v1  ;;  %v2924_v6 = vld [vmem:[#allocation5 + $0x8] sm:$0xff]   ;;  %v2927_v9 = vld [vmem:[#allocation5 + $0xd0] sm:$0xff]  }
  0x2c   :  { %v2921_v3 = vld [vmem:[#allocation5 + $0x80] sm:$0xff]   ;;  %2399 = vmatpush3.bf16.msra.mxu0 %v2920_v2  ;;  %v2925_v7 = vld [vmem:[#allocation5 + $0x88] sm:$0xff]   ;;  %v2928_v10 = vld [vmem:[#allocation5 + $0x10] sm:$0xff]  }
  0x2d   :  { %2463 = vmatpush3.bf16.msra.mxu1 %v2921_v3  ;;  %2400 = vmatprep.subr.bf16.mxu0 %v2922_v4  ;;  %v2929_v11 = vld [vmem:[#allocation5 + $0x90] sm:$0xff]   ;;  %v2930_v12 = vld [vmem:[#allocation5 + $0x58] sm:$0xff]   ;;  %v2934_v16 = vld [vmem:[#allocation5 + $0x60] sm:$0xff]  }
  0x2e   :  { %2464 = vmatprep.subr.bf16.mxu1 %v2923_v5  ;;  %v2931_v13 = vld [vmem:[#allocation5 + $0xd8] sm:$0xff]   ;;  %v2935_v17 = vld [vmem:[#allocation5 + $0xe0] sm:$0xff]   ;;  %v2938_v20 = vld [vmem:[#allocation5 + $0x68] sm:$0xff]  }
  0x2f   :  { %v2932_v14 = vld [vmem:[#allocation5 + $0x18] sm:$0xff]   ;;  %v2936_v18 = vld [vmem:[#allocation5 + $0x20] sm:$0xff]   ;;  %v2939_v21 = vld [vmem:[#allocation5 + $0xe8] sm:$0xff]  }
  0x30   :  { %2401 = vmatpush3.bf16.msra.mxu0 %v2924_v6  ;;  %v2933_v15 = vld [vmem:[#allocation5 + $0x98] sm:$0xff]   ;;  %v2937_v19 = vld [vmem:[#allocation5 + $0xa0] sm:$0xff]   ;;  %v2940_v22 = vld [vmem:[#allocation5 + $0x28] sm:$0xff]  }
  0x31   :  { %2465 = vmatpush3.bf16.msra.mxu1 %v2925_v7  ;;  %2402 = vmatprep.subr.bf16.mxu0 %v2926_v8  ;;  %v2941_v23 = vld [vmem:[#allocation5 + $0xa8] sm:$0xff]   ;;  %v2942_v24 = vld [vmem:[#allocation5 + $0x70] sm:$0xff]   ;;  %v2946_v28 = vld [vmem:[#allocation5 + $0x78] sm:$0xff]  }
  0x32   :  { %2466 = vmatprep.subr.bf16.mxu1 %v2927_v9  ;;  %v2943_v25 = vld [vmem:[#allocation5 + $0xf0] sm:$0xff]   ;;  %v2947_v29 = vld [vmem:[#allocation5 + $0xf8] sm:$0xff]   ;;  %v45_v32 = vld [vmem:[#allocation2 + $0x8] sm:$0xff] }
  0x33   :  { %v2944_v26 = vld [vmem:[#allocation5 + $0x30] sm:$0xff]   ;;  %v2948_v30 = vld [vmem:[#allocation5 + $0x38] sm:$0xff]   ;;  %v61_v33 = vld [vmem:[#allocation2 + $0x88] sm:$0xff] }
  0x34   :  { %2403 = vmatpush3.bf16.msra.mxu0 %v2928_v10  ;;  %v2945_v27 = vld [vmem:[#allocation5 + $0xb0] sm:$0xff]   ;;  %v2949_v31 = vld [vmem:[#allocation5 + $0xb8] sm:$0xff]   ;;  %v301_v35 = vpack.c.bf16 %v61_v33, %v45_v32  ;;  %v44_v37 = vld [vmem:[#allocation2] sm:$0xff] }
  0x35   :  { %2467 = vmatpush3.bf16.msra.mxu1 %v2929_v11  ;;  %2404 = vmatprep.subr.bf16.mxu0 %v2930_v12  ;;  %v47_v34 = vld [vmem:[#allocation2 + $0x18] sm:$0xff]  ;;  %v60_v38 = vld [vmem:[#allocation2 + $0x80] sm:$0xff]  ;;  %v46_v41 = vld [vmem:[#allocation2 + $0x10] sm:$0xff] }
  0x36   :  { %2468 = vmatprep.subr.bf16.mxu1 %v2931_v13  ;;  %v63_v36 = vld [vmem:[#allocation2 + $0x98] sm:$0xff]  ;;  %v300_v40 = vpack.c.bf16 %v60_v38, %v44_v37  ;;  %v62_v42 = vld [vmem:[#allocation2 + $0x90] sm:$0xff]  ;;  %1491 = vmatprep.mubr.bf16.mxu0 %v301_v35  ;;  %v2950_v44 = vld [vmem:[#allocation5 + $0x140] sm:$0xff]  }
  0x37   :  { %v303_v39 = vpack.c.bf16 %v63_v36, %v47_v34  ;;  %v302_v43 = vpack.c.bf16 %v62_v42, %v46_v41  ;;  %v2951_v45 = vld [vmem:[#allocation5 + $0x100] sm:$0xff]   ;;  %v77_v48 = vld [vmem:[#allocation2 + $0x108] sm:$0xff]  ;;  %v79_v50 = vld [vmem:[#allocation2 + $0x118] sm:$0xff] }
  0x38   :  { %2405 = vmatpush3.bf16.msra.mxu0 %v2932_v14  ;;  %v2952_v46 = vld [vmem:[#allocation5 + $0x1c0] sm:$0xff]   ;;  %v93_v49 = vld [vmem:[#allocation2 + $0x188] sm:$0xff]  ;;  %v95_v51 = vld [vmem:[#allocation2 + $0x198] sm:$0xff] }
  0x39   :  { %2469 = vmatpush3.bf16.msra.mxu1 %v2933_v15  ;;  %2406 = vmatprep.subr.bf16.mxu0 %v2934_v16  ;;  %v2953_v47 = vld [vmem:[#allocation5 + $0x180] sm:$0xff]   ;;  %v317_v52 = vpack.c.bf16 %v93_v49, %v77_v48  ;;  %v319_v53 = vpack.c.bf16 %v95_v51, %v79_v50  ;;  %v78_v56 = vld [vmem:[#allocation2 + $0x110] sm:$0xff]  ;;  %v2954_v60 = vld [vmem:[#allocation5 + $0x148] sm:$0xff]  }
  0x3a   :  { %2470 = vmatprep.subr.bf16.mxu1 %v2935_v17  ;;  %1588 = vmatprep.mubr.bf16.mxu1 %v303_v39  ;;  %v76_v54 = vld [vmem:[#allocation2 + $0x100] sm:$0xff]  ;;  %v94_v58 = vld [vmem:[#allocation2 + $0x190] sm:$0xff]  ;;  %v2955_v61 = vld [vmem:[#allocation5 + $0x108] sm:$0xff]  }
  0x3b   :  { %v92_v55 = vld [vmem:[#allocation2 + $0x180] sm:$0xff]  ;;  %v318_v59 = vpack.c.bf16 %v94_v58, %v78_v56  ;;  %v2956_v62 = vld [vmem:[#allocation5 + $0x1c8] sm:$0xff]   ;;  %v111_v3 = vld [vmem:[#allocation2 + $0x218] sm:$0xff] }
  0x3c   :  { %2407 = vmatpush3.bf16.msra.mxu0 %v2936_v18  ;;  %v316_v57 = vpack.c.bf16 %v92_v55, %v76_v54  ;;  %v2957_v63 = vld [vmem:[#allocation5 + $0x188] sm:$0xff]   ;;  %v127_v4 = vld [vmem:[#allocation2 + $0x298] sm:$0xff]  ;;  %v108_v5 = vld [vmem:[#allocation2 + $0x200] sm:$0xff] }
  0x3d   :  { %2471 = vmatpush3.bf16.msra.mxu1 %v2937_v19  ;;  %2408 = vmatprep.subr.bf16.mxu0 %v2938_v20  ;;  %v109_v0 = vld [vmem:[#allocation2 + $0x208] sm:$0xff]  ;;  %v335_v6 = vpack.c.bf16 %v127_v4, %v111_v3  ;;  %v124_v7 = vld [vmem:[#allocation2 + $0x280] sm:$0xff]  ;;  %v110_v8 = vld [vmem:[#allocation2 + $0x210] sm:$0xff] }
  0x3e   :  { %2472 = vmatprep.subr.bf16.mxu1 %v2939_v21  ;;  %v125_v1 = vld [vmem:[#allocation2 + $0x288] sm:$0xff]  ;;  %v126_v9 = vld [vmem:[#allocation2 + $0x290] sm:$0xff]  ;;  %v332_v10 = vpack.c.bf16 %v124_v7, %v108_v5  ;;  %v143_v18 = vld [vmem:[#allocation2 + $0x318] sm:$0xff] }
  0x3f   :  { %v333_v2 = vpack.c.bf16 %v125_v1, %v109_v0  ;;  %v2958_v11 = vld [vmem:[#allocation5 + $0x150] sm:$0xff]   ;;  %v334_v12 = vpack.c.bf16 %v126_v9, %v110_v8  ;;  %v141_v16 = vld [vmem:[#allocation2 + $0x308] sm:$0xff]  ;;  %v159_v20 = vld [vmem:[#allocation2 + $0x398] sm:$0xff] }
  0x40   :  { %2409 = vmatpush3.bf16.msra.mxu0 %v2940_v22  ;;  %v2959_v13 = vld [vmem:[#allocation5 + $0x110] sm:$0xff]   ;;  %v157_v17 = vld [vmem:[#allocation2 + $0x388] sm:$0xff]  ;;  %v140_v21 = vld [vmem:[#allocation2 + $0x300] sm:$0xff] }
  0x41   :  { %2473 = vmatpush3.bf16.msra.mxu1 %v2941_v23  ;;  %2410 = vmatprep.subr.bf16.mxu0 %v2942_v24  ;;  %v2960_v14 = vld [vmem:[#allocation5 + $0x1d0] sm:$0xff]   ;;  %v349_v19 = vpack.c.bf16 %v157_v17, %v141_v16  ;;  %v156_v22 = vld [vmem:[#allocation2 + $0x380] sm:$0xff]  ;;  %v351_v23 = vpack.c.bf16 %v159_v20, %v143_v18  ;;  %v173_v32 = vld [vmem:[#allocation2 + $0x408] sm:$0xff] }
  0x42   :  { %2474 = vmatprep.subr.bf16.mxu1 %v2943_v25  ;;  %v2961_v15 = vld [vmem:[#allocation5 + $0x190] sm:$0xff]   ;;  %v189_v33 = vld [vmem:[#allocation2 + $0x488] sm:$0xff]  ;;  %v175_v34 = vld [vmem:[#allocation2 + $0x418] sm:$0xff] }
  0x43   :  { %v142_v24 = vld [vmem:[#allocation2 + $0x310] sm:$0xff]  ;;  %v191_v35 = vld [vmem:[#allocation2 + $0x498] sm:$0xff]  ;;  %v365_v36 = vpack.c.bf16 %v189_v33, %v173_v32  ;;  %v172_v38 = vld [vmem:[#allocation2 + $0x400] sm:$0xff] }
  0x44   :  { %2411 = vmatpush3.bf16.msra.mxu0 %v2944_v26  ;;  %v158_v25 = vld [vmem:[#allocation2 + $0x390] sm:$0xff]  ;;  %v2962_v26 = vld [vmem:[#allocation5 + $0x158] sm:$0xff]   ;;  %v367_v37 = vpack.c.bf16 %v191_v35, %v175_v34  ;;  %v188_v39 = vld [vmem:[#allocation2 + $0x480] sm:$0xff] }
  0x45   :  { %2475 = vmatpush3.bf16.msra.mxu1 %v2945_v27  ;;  %2412 = vmatprep.subr.bf16.mxu0 %v2946_v28  ;;  %v348_v27 = vpack.c.bf16 %v156_v22, %v140_v21  ;;  %v2963_v28 = vld [vmem:[#allocation5 + $0x118] sm:$0xff]   ;;  %v190_v41 = vld [vmem:[#allocation2 + $0x490] sm:$0xff]  ;;  %v2966_v42 = vld [vmem:[#allocation5 + $0x160] sm:$0xff]  }
  0x46   :  { %2476 = vmatprep.subr.bf16.mxu1 %v2947_v29  ;;  %v350_v29 = vpack.c.bf16 %v158_v25, %v142_v24  ;;  %v205_v48 = vld [vmem:[#allocation2 + $0x508] sm:$0xff]  ;;  %v207_v51 = vld [vmem:[#allocation2 + $0x518] sm:$0xff]  ;;  %v204_v54 = vld [vmem:[#allocation2 + $0x500] sm:$0xff] }
  0x47   :  { %v221_v49 = vld [vmem:[#allocation2 + $0x588] sm:$0xff]  ;;  %v220_v55 = vld [vmem:[#allocation2 + $0x580] sm:$0xff]  ;;  %v206_v56 = vld [vmem:[#allocation2 + $0x510] sm:$0xff] }
  0x48   :  { %2413 = vmatpush3.bf16.msra.mxu0 %v2948_v30  ;;  %v2964_v30 = vld [vmem:[#allocation5 + $0x1d8] sm:$0xff]   ;;  %v381_v50 = vpack.c.bf16 %v221_v49, %v205_v48  ;;  %v2970_v58 = vld [vmem:[#allocation5 + $0x168] sm:$0xff]   ;;  %v252_v7 = vld [vmem:[#allocation2 + $0x680] sm:$0xff] }
  0x49   :  { %2477 = vmatpush3.bf16.msra.mxu1 %v2949_v31  ;;  %2526 = vmatprep.subr.bf16.mxu0 %v2950_v44  ;;  %v2965_v31 = vld [vmem:[#allocation5 + $0x198] sm:$0xff]   ;;  %v364_v44 = vpack.c.bf16 %v188_v39, %v172_v38  ;;  %v253_v0 = vld [vmem:[#allocation2 + $0x688] sm:$0xff]  ;;  %v2974_v8 = vld [vmem:[#allocation5 + $0x170] sm:$0xff]  }
  0x4a   :  { %2590 = vmatprep.subr.bf16.mxu1 %v2952_v46  ;;  %v239_v1 = vld [vmem:[#allocation2 + $0x618] sm:$0xff]  ;;  %v238_v9 = vld [vmem:[#allocation2 + $0x610] sm:$0xff]  ;;  %v2982_v35 = vld [vmem:[#allocation5 + $0x240] sm:$0xff]  }
  0x4b   :  { %1492 = vmatmul.mubr.bf16.vlgmr.msra.gmra.mrb[0].mxu0 %v300_v40  ;;  %v174_v40 = vld [vmem:[#allocation2 + $0x410] sm:$0xff]  ;;  %v255_v4 = vld [vmem:[#allocation2 + $0x698] sm:$0xff]  ;;  %v2984_v39 = vld [vmem:[#allocation5 + $0x2c0] sm:$0xff]  }
  0x4c   :  { %1589 = vmatmul.mubr.bf16.vlgmr.msra.gmra.mrb[0].mxu1 %v302_v43  ;;  %2527 = vmatpush3.bf16.msra.mxu0 %v2951_v45  ;;  %v2967_v43 = vld [vmem:[#allocation5 + $0x120] sm:$0xff]   ;;  %v366_v46 = vpack.c.bf16 %v190_v41, %v174_v40  ;;  %v399_v5 = vpack.c.bf16 %v255_v4, %v239_v1  ;;  %v271_v16 = vld [vmem:[#allocation2 + $0x718] sm:$0xff]  ;;  %v2990_v1 = vld [vmem:[#allocation5 + $0x250] sm:$0xff]  }
  0x4d   :  { %2591 = vmatpush3.bf16.msra.mxu1 %v2953_v47  ;;  %1499 = vmatprep.mubr.bf16.mxu0 %v317_v52  ;;  %v2968_v45 = vld [vmem:[#allocation5 + $0x1e0] sm:$0xff]   ;;  %v223_v52 = vld [vmem:[#allocation2 + $0x598] sm:$0xff]  ;;  %v2992_v4 = vld [vmem:[#allocation5 + $0x2d0] sm:$0xff]  }
  0x4e   :  { %1596 = vmatprep.mubr.bf16.mxu1 %v319_v53  ;;  %2528 = vmatprep.subr.bf16.mxu0 %v2954_v60  ;;  %v2969_v47 = vld [vmem:[#allocation5 + $0x1a0] sm:$0xff]   ;;  %v383_v53 = vpack.c.bf16 %v223_v52, %v207_v51  ;;  %v2972_v60 = vld [vmem:[#allocation5 + $0x1e8] sm:$0xff]   ;;  %v287_v17 = vld [vmem:[#allocation2 + $0x798] sm:$0xff] }
  0x4f   :  { %2592 = vmatprep.subr.bf16.mxu1 %v2956_v62  ;;  %v380_v62 = vpack.c.bf16 %v220_v55, %v204_v54  ;;  %v415_v21 = vpack.c.bf16 %v287_v17, %v271_v16  ;;  %v2978_v22 = vld [vmem:[#allocation5 + $0x178] sm:$0xff]   ;;  %v48_v40 = vld [vmem:[#allocation2 + $0x20] sm:$0xff] }
  0x50   :  { %2529 = vmatpush3.bf16.msra.mxu0 %v2955_v61  ;;  %v2973_v61 = vld [vmem:[#allocation5 + $0x1a8] sm:$0xff]   ;;  %v2979_v24 = vld [vmem:[#allocation5 + $0x138] sm:$0xff]   ;;  %v64_v41 = vld [vmem:[#allocation2 + $0xa0] sm:$0xff] }
  0x51   :  { %2593 = vmatpush3.bf16.msra.mxu1 %v2957_v63  ;;  %2530 = vmatprep.subr.bf16.mxu0 %v2958_v11  ;;  %v237_v63 = vld [vmem:[#allocation2 + $0x608] sm:$0xff]  ;;  %v2975_v11 = vld [vmem:[#allocation5 + $0x130] sm:$0xff]   ;;  %v2980_v25 = vld [vmem:[#allocation5 + $0x1f8] sm:$0xff]  }
  0x52   :  { %2594 = vmatprep.subr.bf16.mxu1 %v2960_v14  ;;  %v397_v3 = vpack.c.bf16 %v253_v0, %v237_v63  ;;  %v269_v14 = vld [vmem:[#allocation2 + $0x708] sm:$0xff]  ;;  %v51_v32 = vld [vmem:[#allocation2 + $0x38] sm:$0xff]  ;;  %v2985_v51 = vld [vmem:[#allocation5 + $0x280] sm:$0xff]  }
  0x53   :  { %1500 = vmatmul.mubr.bf16.gmra.mrb[4].mxu0 %v316_v57  ;;  %v222_v57 = vld [vmem:[#allocation2 + $0x590] sm:$0xff]  ;;  %v67_v33 = vld [vmem:[#allocation2 + $0xb8] sm:$0xff]  ;;  %v80_v54 = vld [vmem:[#allocation2 + $0x120] sm:$0xff] }
  0x54   :  { %1597 = vmatmul.mubr.bf16.gmra.mrb[4].mxu1 %v318_v59  ;;  %1507 = vmatprep.mubr.bf16.mxu0 %v333_v2  ;;  %v2971_v59 = vld [vmem:[#allocation5 + $0x128] sm:$0xff]   ;;  %v382_v2 = vpack.c.bf16 %v222_v57, %v206_v56  ;;  %v307_v38 = vpack.c.bf16 %v67_v33, %v51_v32  ;;  %v99_v48 = vld [vmem:[#allocation2 + $0x1b8] sm:$0xff]  ;;  %v96_v55 = vld [vmem:[#allocation2 + $0x1a0] sm:$0xff] }
  0x55   :  { %1604 = vmatprep.mubr.bf16.mxu1 %v335_v6  ;;  %2531 = vmatpush3.bf16.msra.mxu0 %v2959_v13  ;;  %v236_v6 = vld [vmem:[#allocation2 + $0x600] sm:$0xff]  ;;  %v2977_v13 = vld [vmem:[#allocation5 + $0x1b0] sm:$0xff]   ;;  %v2986_v56 = vld [vmem:[#allocation5 + $0x248] sm:$0xff]  }
  0x56   :  { %2595 = vmatpush3.bf16.msra.mxu1 %v2961_v15  ;;  %2532 = vmatprep.subr.bf16.mxu0 %v2962_v26  ;;  %v285_v15 = vld [vmem:[#allocation2 + $0x788] sm:$0xff]  ;;  %v396_v18 = vpack.c.bf16 %v252_v7, %v236_v6  ;;  %v284_v26 = vld [vmem:[#allocation2 + $0x780] sm:$0xff]  ;;  %v115_v0 = vld [vmem:[#allocation2 + $0x238] sm:$0xff] }
  0x57   :  { %2596 = vmatprep.subr.bf16.mxu1 %v2964_v30  ;;  %v413_v20 = vpack.c.bf16 %v285_v15, %v269_v14  ;;  %v49_v30 = vld [vmem:[#allocation2 + $0x28] sm:$0xff]  ;;  %v2994_v16 = vld [vmem:[#allocation5 + $0x258] sm:$0xff]   ;;  %v2999_v32 = vld [vmem:[#allocation5 + $0x220] sm:$0xff]  }
  0x58   :  { %v2987_v57 = vld [vmem:[#allocation5 + $0x208] sm:$0xff]   ;;  %v147_v17 = vld [vmem:[#allocation2 + $0x338] sm:$0xff]  ;;  %v3000_v33 = vld [vmem:[#allocation5 + $0x2e0] sm:$0xff]  }
  0x59   :  { %2533 = vmatpush3.bf16.msra.mxu0 %v2963_v28  ;;  %v2981_v28 = vld [vmem:[#allocation5 + $0x1b8] sm:$0xff]   ;;  %v129_v63 = vld [vmem:[#allocation2 + $0x2a8] sm:$0xff] }
  0x5a   :  { %2597 = vmatpush3.bf16.msra.mxu1 %v2965_v31  ;;  %2534 = vmatprep.subr.bf16.mxu0 %v2966_v42  ;;  %v65_v31 = vld [vmem:[#allocation2 + $0xa8] sm:$0xff]  ;;  %v50_v42 = vld [vmem:[#allocation2 + $0x30] sm:$0xff] }
  0x5b   :  { %1508 = vmatmul.mubr.bf16.gmra.mrb[8].mxu0 %v332_v10  ;;  %2598 = vmatprep.subr.bf16.mxu1 %v2968_v45  ;;  %v254_v10 = vld [vmem:[#allocation2 + $0x690] sm:$0xff]  ;;  %v97_v45 = vld [vmem:[#allocation2 + $0x1a8] sm:$0xff] }
  0x5c   :  { %1605 = vmatmul.mubr.bf16.gmra.mrb[8].mxu1 %v334_v12  ;;  %1515 = vmatprep.mubr.bf16.mxu0 %v349_v19  ;;  %v2976_v12 = vld [vmem:[#allocation5 + $0x1f0] sm:$0xff]   ;;  %v398_v19 = vpack.c.bf16 %v254_v10, %v238_v9  ;;  %v112_v9 = vld [vmem:[#allocation2 + $0x220] sm:$0xff]  ;;  %v145_v14 = vld [vmem:[#allocation2 + $0x328] sm:$0xff] }
  0x5d   :  { %1612 = vmatprep.mubr.bf16.mxu1 %v351_v23  ;;  %2535 = vmatpush3.bf16.msra.mxu0 %v2967_v43  ;;  %v268_v23 = vld [vmem:[#allocation2 + $0x700] sm:$0xff]  ;;  %v66_v43 = vld [vmem:[#allocation2 + $0xb0] sm:$0xff]  ;;  %v161_v15 = vld [vmem:[#allocation2 + $0x3a8] sm:$0xff] }
  0x5e   :  { %2599 = vmatpush3.bf16.msra.mxu1 %v2969_v47  ;;  %2536 = vmatprep.subr.bf16.mxu0 %v2970_v58  ;;  %v412_v34 = vpack.c.bf16 %v284_v26, %v268_v23  ;;  %v304_v47 = vpack.c.bf16 %v64_v41, %v48_v40  ;;  %v306_v49 = vpack.c.bf16 %v66_v43, %v50_v42  ;;  %v2988_v58 = vld [vmem:[#allocation5 + $0x2c8] sm:$0xff]   ;;  %v128_v10 = vld [vmem:[#allocation2 + $0x2a0] sm:$0xff] }
  0x5f   :  { %2600 = vmatprep.subr.bf16.mxu1 %v2972_v60  ;;  %v98_v60 = vld [vmem:[#allocation2 + $0x1b0] sm:$0xff]  ;;  %v144_v26 = vld [vmem:[#allocation2 + $0x320] sm:$0xff]  ;;  %v3002_v42 = vld [vmem:[#allocation5 + $0x268] sm:$0xff]  }
  0x60   :  { %v176_v43 = vld [vmem:[#allocation2 + $0x420] sm:$0xff] }
  0x61   :  { %2537 = vmatpush3.bf16.msra.mxu0 %v2971_v59  ;;  %v82_v59 = vld [vmem:[#allocation2 + $0x130] sm:$0xff] }
  0x62   :  { %2601 = vmatpush3.bf16.msra.mxu1 %v2973_v61  ;;  %2538 = vmatprep.subr.bf16.mxu0 %v2974_v8  ;;  %v2989_v61 = vld [vmem:[#allocation5 + $0x288] sm:$0xff]   ;;  %v2991_v8 = vld [vmem:[#allocation5 + $0x210] sm:$0xff]  }
  0x63   :  { %1516 = vmatmul.mubr.bf16.gmra.mrb[12].mxu0 %v348_v27  ;;  %2602 = vmatprep.subr.bf16.mxu1 %v2976_v12  ;;  %v270_v27 = vld [vmem:[#allocation2 + $0x710] sm:$0xff] }
  0x64   :  { %1613 = vmatmul.mubr.bf16.gmra.mrb[12].mxu1 %v350_v29  ;;  %1523 = vmatprep.mubr.bf16.mxu0 %v365_v36  ;;  %v286_v29 = vld [vmem:[#allocation2 + $0x790] sm:$0xff] }
  0x65   :  { %1620 = vmatprep.mubr.bf16.mxu1 %v367_v37  ;;  %2539 = vmatpush3.bf16.msra.mxu0 %v2975_v11  ;;  %v414_v36 = vpack.c.bf16 %v286_v29, %v270_v27  ;;  %v305_v37 = vpack.c.bf16 %v65_v31, %v49_v30  ;;  %v2993_v11 = vld [vmem:[#allocation5 + $0x290] sm:$0xff]   ;;  %v160_v27 = vld [vmem:[#allocation2 + $0x3a0] sm:$0xff]  ;;  %v177_v31 = vld [vmem:[#allocation2 + $0x428] sm:$0xff] }
  0x66   :  { %2603 = vmatpush3.bf16.msra.mxu1 %v2977_v13  ;;  %2540 = vmatprep.subr.bf16.mxu0 %v2978_v22  ;;  %v114_v12 = vld [vmem:[#allocation2 + $0x230] sm:$0xff]  ;;  %v336_v22 = vpack.c.bf16 %v128_v10, %v112_v9 }
  0x67   :  { %2604 = vmatprep.subr.bf16.mxu1 %v2980_v25  ;;  %v130_v13 = vld [vmem:[#allocation2 + $0x2b0] sm:$0xff] }
  0x68   :  { %v338_v23 = vpack.c.bf16 %v130_v13, %v114_v12  ;;  %v146_v29 = vld [vmem:[#allocation2 + $0x330] sm:$0xff]  ;;  %v3013_v13 = vld [vmem:[#allocation5 + $0x2b8] sm:$0xff]  }
  0x69   :  { %2541 = vmatpush3.bf16.msra.mxu0 %v2979_v24  ;;  %v353_v24 = vpack.c.bf16 %v161_v15, %v145_v14  ;;  %v162_v30 = vld [vmem:[#allocation2 + $0x3b0] sm:$0xff]  ;;  %v240_v14 = vld [vmem:[#allocation2 + $0x620] sm:$0xff] }
  0x6a   :  { %2605 = vmatpush3.bf16.msra.mxu1 %v2981_v28  ;;  %2654 = vmatprep.subr.bf16.mxu0 %v2982_v35  ;;  %v2998_v28 = vld [vmem:[#allocation5 + $0x260] sm:$0xff]  }
  0x6b   :  { %1524 = vmatmul.mubr.bf16.gmra.mrb[16].mxu0 %v364_v44  ;;  %2718 = vmatprep.subr.bf16.mxu1 %v2984_v39  ;;  %v81_v44 = vld [vmem:[#allocation2 + $0x128] sm:$0xff]  ;;  %v3001_v35 = vld [vmem:[#allocation5 + $0x2a0] sm:$0xff]   ;;  %v354_v39 = vpack.c.bf16 %v162_v30, %v146_v29  ;;  %v274_v30 = vld [vmem:[#allocation2 + $0x730] sm:$0xff] }
  0x6c   :  { %1621 = vmatmul.mubr.bf16.gmra.mrb[16].mxu1 %v366_v46  ;;  %1531 = vmatprep.mubr.bf16.mxu0 %v381_v50  ;;  %v83_v46 = vld [vmem:[#allocation2 + $0x138] sm:$0xff]  ;;  %v2983_v50 = vld [vmem:[#allocation5 + $0x200] sm:$0xff]   ;;  %v321_v52 = vpack.c.bf16 %v97_v45, %v81_v44  ;;  %v3003_v44 = vld [vmem:[#allocation5 + $0x228] sm:$0xff]  }
  0x6d   :  { %1628 = vmatprep.mubr.bf16.mxu1 %v383_v53  ;;  %v323_v53 = vpack.c.bf16 %v99_v48, %v83_v46  ;;  %v3004_v45 = vld [vmem:[#allocation5 + $0x2e8] sm:$0xff]   ;;  %v192_v46 = vld [vmem:[#allocation2 + $0x4a0] sm:$0xff] }
  0x6e   :  { %v3005_v48 = vld [vmem:[#allocation5 + $0x2a8] sm:$0xff]   ;;  %v256_v15 = vld [vmem:[#allocation2 + $0x6a0] sm:$0xff] }
  0x6f   :  { %v288_v29 = vld [vmem:[#allocation2 + $0x7a0] sm:$0xff] }
  0x73   :  { %1532 = vmatmul.mubr.bf16.gmra.mrb[20].mxu0 %v380_v62  ;;  %v113_v62 = vld [vmem:[#allocation2 + $0x228] sm:$0xff] }
  0x74   :  { %1629 = vmatmul.mubr.bf16.gmra.mrb[20].mxu1 %v382_v2  ;;  %1539 = vmatprep.mubr.bf16.mxu0 %v397_v3  ;;  %v131_v2 = vld [vmem:[#allocation2 + $0x2b8] sm:$0xff]  ;;  %v320_v3 = vpack.c.bf16 %v96_v55, %v80_v54  ;;  %v337_v6 = vpack.c.bf16 %v129_v63, %v113_v62  ;;  %v368_v54 = vpack.c.bf16 %v192_v46, %v176_v43  ;;  %v3006_v55 = vld [vmem:[#allocation5 + $0x270] sm:$0xff]   ;;  %v208_v62 = vld [vmem:[#allocation2 + $0x520] sm:$0xff] }
  0x75   :  { %1636 = vmatprep.mubr.bf16.mxu1 %v399_v5  ;;  %v322_v5 = vpack.c.bf16 %v98_v60, %v82_v59  ;;  %v339_v7 = vpack.c.bf16 %v131_v2, %v115_v0  ;;  %v3008_v60 = vld [vmem:[#allocation5 + $0x2f0] sm:$0xff]   ;;  %v224_v63 = vld [vmem:[#allocation2 + $0x5a0] sm:$0xff]  ;;  %v241_v2 = vld [vmem:[#allocation2 + $0x628] sm:$0xff] }
  0x76   :  { %v210_v0 = vld [vmem:[#allocation2 + $0x530] sm:$0xff] }
  0x77   :  { %v70_v43 = vld [vmem:[#allocation2 + $0xd0] sm:$0xff] }
  0x7b   :  { %1540 = vmatmul.mubr.bf16.gmra.mrb[24].mxu0 %v396_v18  ;;  %v163_v18 = vld [vmem:[#allocation2 + $0x3b8] sm:$0xff] }
  0x7c   :  { %1637 = vmatmul.mubr.bf16.gmra.mrb[24].mxu1 %v398_v19  ;;  %1547 = vmatprep.mubr.bf16.mxu0 %v413_v20  ;;  %v2995_v19 = vld [vmem:[#allocation5 + $0x218] sm:$0xff]   ;;  %v355_v25 = vpack.c.bf16 %v163_v18, %v147_v17  ;;  %v258_v17 = vld [vmem:[#allocation2 + $0x6b0] sm:$0xff]  ;;  %v273_v18 = vld [vmem:[#allocation2 + $0x728] sm:$0xff] }
  0x7d   :  { %1644 = vmatprep.mubr.bf16.mxu1 %v415_v21  ;;  %v2996_v20 = vld [vmem:[#allocation5 + $0x2d8] sm:$0xff]  }
  0x7e   :  { %v2997_v21 = vld [vmem:[#allocation5 + $0x298] sm:$0xff]  }
  0x83   :  { %1548 = vmatmul.mubr.bf16.gmra.mrb[28].mxu0 %v412_v34  ;;  %v193_v34 = vld [vmem:[#allocation2 + $0x4a8] sm:$0xff] }
  0x84   :  { %1645 = vmatmul.mubr.bf16.gmra.mrb[28].mxu1 %v414_v36  ;;  %1685 = vmatprep.mubr.bf16.mxu0 %v305_v37  ;;  %v179_v36 = vld [vmem:[#allocation2 + $0x438] sm:$0xff]  ;;  %v369_v40 = vpack.c.bf16 %v193_v34, %v177_v31  ;;  %v290_v31 = vld [vmem:[#allocation2 + $0x7b0] sm:$0xff] }
  0x85   :  { %1782 = vmatprep.mubr.bf16.mxu1 %v307_v38  ;;  %v195_v37 = vld [vmem:[#allocation2 + $0x4b8] sm:$0xff]  ;;  %v352_v38 = vpack.c.bf16 %v160_v27, %v144_v26 }
  0x86   :  { %v371_v41 = vpack.c.bf16 %v195_v37, %v179_v36  ;;  %v55_v34 = vld [vmem:[#allocation2 + $0x58] sm:$0xff]  ;;  %v418_v37 = vpack.c.bf16 %v290_v31, %v274_v30  ;;  %v164_v30 = vld [vmem:[#allocation2 + $0x3c0] sm:$0xff] }
  0x87   :  { %v3033_v31 = vld [vmem:[#allocation5 + $0x3a0] sm:$0xff]  }
  0x8b   :  { %1686 = vmatmul.mubr.bf16.vlgmr.msra.gmra.mrb[32].mxu0 %v304_v47  ;;  %v178_v47 = vld [vmem:[#allocation2 + $0x430] sm:$0xff] }
  0x8c   :  { %1783 = vmatmul.mubr.bf16.vlgmr.msra.gmra.mrb[32].mxu1 %v306_v49  ;;  %2655 = vmatpush3.bf16.msra.mxu0 %v2983_v50  ;;  %v194_v49 = vld [vmem:[#allocation2 + $0x4b0] sm:$0xff]  ;;  %v209_v50 = vld [vmem:[#allocation2 + $0x528] sm:$0xff] }
  0x8d   :  { %2719 = vmatpush3.bf16.msra.mxu1 %v2985_v51  ;;  %1693 = vmatprep.mubr.bf16.mxu0 %v321_v52  ;;  %v225_v51 = vld [vmem:[#allocation2 + $0x5a8] sm:$0xff]  ;;  %v211_v52 = vld [vmem:[#allocation2 + $0x538] sm:$0xff] }
  0x8e   :  { %1790 = vmatprep.mubr.bf16.mxu1 %v323_v53  ;;  %2656 = vmatprep.subr.bf16.mxu0 %v2986_v56  ;;  %v227_v53 = vld [vmem:[#allocation2 + $0x5b8] sm:$0xff]  ;;  %v370_v56 = vpack.c.bf16 %v194_v49, %v178_v47 }
  0x8f   :  { %2720 = vmatprep.subr.bf16.mxu1 %v2988_v58  ;;  %v3007_v58 = vld [vmem:[#allocation5 + $0x230] sm:$0xff]   ;;  %v387_v59 = vpack.c.bf16 %v227_v53, %v211_v52  ;;  %v87_v47 = vld [vmem:[#allocation2 + $0x158] sm:$0xff] }
  0x90   :  { %2657 = vmatpush3.bf16.msra.mxu0 %v2987_v57  ;;  %v385_v57 = vpack.c.bf16 %v225_v51, %v209_v50  ;;  %v3015_v50 = vld [vmem:[#allocation5 + $0x300] sm:$0xff]  }
  0x91   :  { %2721 = vmatpush3.bf16.msra.mxu1 %v2989_v61  ;;  %2658 = vmatprep.subr.bf16.mxu0 %v2990_v1  ;;  %v3009_v61 = vld [vmem:[#allocation5 + $0x2b0] sm:$0xff]   ;;  %v3017_v51 = vld [vmem:[#allocation5 + $0x380] sm:$0xff]  }
  0x92   :  { %2722 = vmatprep.subr.bf16.mxu1 %v2992_v4  ;;  %v226_v1 = vld [vmem:[#allocation2 + $0x5b0] sm:$0xff]  ;;  %v243_v4 = vld [vmem:[#allocation2 + $0x638] sm:$0xff] }
  0x93   :  { %1694 = vmatmul.mubr.bf16.gmra.mrb[36].mxu0 %v320_v3  ;;  %v257_v3 = vld [vmem:[#allocation2 + $0x6a8] sm:$0xff]  ;;  %v386_v9 = vpack.c.bf16 %v226_v1, %v210_v0  ;;  %v3022_v0 = vld [vmem:[#allocation5 + $0x350] sm:$0xff]   ;;  %v119_v1 = vld [vmem:[#allocation2 + $0x258] sm:$0xff] }
  0x94   :  { %1791 = vmatmul.mubr.bf16.gmra.mrb[36].mxu1 %v322_v5  ;;  %1701 = vmatprep.mubr.bf16.mxu0 %v337_v6  ;;  %v259_v5 = vld [vmem:[#allocation2 + $0x6b8] sm:$0xff]  ;;  %v401_v10 = vpack.c.bf16 %v257_v3, %v241_v2  ;;  %v3024_v3 = vld [vmem:[#allocation5 + $0x3d0] sm:$0xff]  }
  0x95   :  { %1798 = vmatprep.mubr.bf16.mxu1 %v339_v7  ;;  %2659 = vmatpush3.bf16.msra.mxu0 %v2991_v8  ;;  %v3010_v6 = vld [vmem:[#allocation5 + $0x278] sm:$0xff]   ;;  %v384_v7 = vpack.c.bf16 %v224_v63, %v208_v62  ;;  %v403_v12 = vpack.c.bf16 %v259_v5, %v243_v4  ;;  %v117_v62 = vld [vmem:[#allocation2 + $0x248] sm:$0xff] }
  0x96   :  { %2723 = vmatpush3.bf16.msra.mxu1 %v2993_v11  ;;  %2660 = vmatprep.subr.bf16.mxu0 %v2994_v16  ;;  %v3011_v8 = vld [vmem:[#allocation5 + $0x238] sm:$0xff]   ;;  %v242_v16 = vld [vmem:[#allocation2 + $0x630] sm:$0xff]  ;;  %v133_v63 = vld [vmem:[#allocation2 + $0x2c8] sm:$0xff] }
  0x97   :  { %2724 = vmatprep.subr.bf16.mxu1 %v2996_v20  ;;  %v3012_v11 = vld [vmem:[#allocation5 + $0x2f8] sm:$0xff]  }
  0x98   :  { %v275_v20 = vld [vmem:[#allocation2 + $0x738] sm:$0xff] }
  0x99   :  { %2661 = vmatpush3.bf16.msra.mxu0 %v2995_v19  ;;  %v289_v19 = vld [vmem:[#allocation2 + $0x7a8] sm:$0xff]  ;;  %v135_v2 = vld [vmem:[#allocation2 + $0x2d8] sm:$0xff] }
  0x9a   :  { %2725 = vmatpush3.bf16.msra.mxu1 %v2997_v21  ;;  %2662 = vmatprep.subr.bf16.mxu0 %v2998_v28  ;;  %v3014_v21 = vld [vmem:[#allocation5 + $0x340] sm:$0xff]   ;;  %v417_v26 = vpack.c.bf16 %v289_v19, %v273_v18  ;;  %v151_v18 = vld [vmem:[#allocation2 + $0x358] sm:$0xff] }
  0x9b   :  { %1702 = vmatmul.mubr.bf16.gmra.mrb[40].mxu0 %v336_v22  ;;  %2726 = vmatprep.subr.bf16.mxu1 %v3000_v33  ;;  %v291_v22 = vld [vmem:[#allocation2 + $0x7b8] sm:$0xff]  ;;  %v272_v28 = vld [vmem:[#allocation2 + $0x720] sm:$0xff]  ;;  %v69_v33 = vld [vmem:[#allocation2 + $0xc8] sm:$0xff] }
  0x9c   :  { %1799 = vmatmul.mubr.bf16.gmra.mrb[40].mxu1 %v338_v23  ;;  %1709 = vmatprep.mubr.bf16.mxu0 %v353_v24  ;;  %v400_v23 = vpack.c.bf16 %v256_v15, %v240_v14  ;;  %v3016_v24 = vld [vmem:[#allocation5 + $0x3c0] sm:$0xff]   ;;  %v419_v27 = vpack.c.bf16 %v291_v22, %v275_v20  ;;  %v416_v36 = vpack.c.bf16 %v288_v29, %v272_v28  ;;  %v134_v14 = vld [vmem:[#allocation2 + $0x2d0] sm:$0xff]  ;;  %v149_v15 = vld [vmem:[#allocation2 + $0x348] sm:$0xff] }
  0x9d   :  { %1806 = vmatprep.mubr.bf16.mxu1 %v355_v25  ;;  %2663 = vmatpush3.bf16.msra.mxu0 %v2999_v32  ;;  %v402_v25 = vpack.c.bf16 %v258_v17, %v242_v16  ;;  %v53_v32 = vld [vmem:[#allocation2 + $0x48] sm:$0xff]  ;;  %v3028_v16 = vld [vmem:[#allocation5 + $0x3d8] sm:$0xff]   ;;  %v3030_v22 = vld [vmem:[#allocation5 + $0x360] sm:$0xff]  }
  0x9e   :  { %2727 = vmatpush3.bf16.msra.mxu1 %v3001_v35  ;;  %2664 = vmatprep.subr.bf16.mxu0 %v3002_v42  ;;  %v71_v35 = vld [vmem:[#allocation2 + $0xd8] sm:$0xff]  ;;  %v54_v42 = vld [vmem:[#allocation2 + $0x50] sm:$0xff]  ;;  %v165_v17 = vld [vmem:[#allocation2 + $0x3c8] sm:$0xff] }
  0x9f   :  { %2728 = vmatprep.subr.bf16.mxu1 %v3004_v45  ;;  %v101_v45 = vld [vmem:[#allocation2 + $0x1c8] sm:$0xff]  ;;  %v310_v49 = vpack.c.bf16 %v70_v43, %v54_v42  ;;  %v167_v19 = vld [vmem:[#allocation2 + $0x3d8] sm:$0xff]  ;;  %v3031_v28 = vld [vmem:[#allocation5 + $0x320] sm:$0xff]  }
  0xa0   :  { %v3027_v20 = vld [vmem:[#allocation5 + $0x318] sm:$0xff]   ;;  %v148_v29 = vld [vmem:[#allocation2 + $0x340] sm:$0xff]  ;;  %v3038_v42 = vld [vmem:[#allocation5 + $0x370] sm:$0xff]  }
  0xa1   :  { %2665 = vmatpush3.bf16.msra.mxu0 %v3003_v44  ;;  %v85_v44 = vld [vmem:[#allocation2 + $0x148] sm:$0xff]  ;;  %v356_v43 = vpack.c.bf16 %v164_v30, %v148_v29  ;;  %v294_v29 = vld [vmem:[#allocation2 + $0x7d0] sm:$0xff] }
  0xa2   :  { %2729 = vmatpush3.bf16.msra.mxu1 %v3005_v48  ;;  %2666 = vmatprep.subr.bf16.mxu0 %v3006_v55  ;;  %v103_v48 = vld [vmem:[#allocation2 + $0x1d8] sm:$0xff]  ;;  %v325_v52 = vpack.c.bf16 %v101_v45, %v85_v44  ;;  %v100_v55 = vld [vmem:[#allocation2 + $0x1c0] sm:$0xff]  ;;  %v3040_v44 = vld [vmem:[#allocation5 + $0x3f0] sm:$0xff]  }
  0xa3   :  { %1710 = vmatmul.mubr.bf16.gmra.mrb[44].mxu0 %v352_v38  ;;  %2730 = vmatprep.subr.bf16.mxu1 %v3008_v60  ;;  %v309_v38 = vpack.c.bf16 %v69_v33, %v53_v32  ;;  %v327_v53 = vpack.c.bf16 %v103_v48, %v87_v47  ;;  %v3019_v60 = vld [vmem:[#allocation5 + $0x308] sm:$0xff]   ;;  %v150_v33 = vld [vmem:[#allocation2 + $0x350] sm:$0xff] }
  0xa4   :  { %1807 = vmatmul.mubr.bf16.gmra.mrb[44].mxu1 %v354_v39  ;;  %1717 = vmatprep.mubr.bf16.mxu0 %v369_v40  ;;  %v311_v39 = vpack.c.bf16 %v71_v35, %v55_v34  ;;  %v52_v40 = vld [vmem:[#allocation2 + $0x40] sm:$0xff]  ;;  %v3034_v32 = vld [vmem:[#allocation5 + $0x368] sm:$0xff]   ;;  %v166_v34 = vld [vmem:[#allocation2 + $0x3d0] sm:$0xff] }
  0xa5   :  { %1814 = vmatprep.mubr.bf16.mxu1 %v371_v41  ;;  %2667 = vmatpush3.bf16.msra.mxu0 %v3007_v58  ;;  %v68_v41 = vld [vmem:[#allocation2 + $0xc0] sm:$0xff]  ;;  %v3020_v58 = vld [vmem:[#allocation5 + $0x3c8] sm:$0xff]   ;;  %v358_v45 = vpack.c.bf16 %v166_v34, %v150_v33  ;;  %v3039_v48 = vld [vmem:[#allocation5 + $0x330] sm:$0xff]  }
  0xa6   :  { %2731 = vmatpush3.bf16.msra.mxu1 %v3009_v61  ;;  %2668 = vmatprep.subr.bf16.mxu0 %v3010_v6  ;;  %v308_v46 = vpack.c.bf16 %v68_v41, %v52_v40  ;;  %v3021_v61 = vld [vmem:[#allocation5 + $0x388] sm:$0xff]   ;;  %v341_v6 = vpack.c.bf16 %v133_v63, %v117_v62  ;;  %v75_v33 = vld [vmem:[#allocation2 + $0xf8] sm:$0xff] }
  0xa7   :  { %2732 = vmatprep.subr.bf16.mxu1 %v3012_v11  ;;  %v132_v11 = vld [vmem:[#allocation2 + $0x2c0] sm:$0xff]  ;;  %v181_v35 = vld [vmem:[#allocation2 + $0x448] sm:$0xff] }
  0xa8   :  { %v3035_v40 = vld [vmem:[#allocation5 + $0x328] sm:$0xff]  }
  0xa9   :  { %2669 = vmatpush3.bf16.msra.mxu0 %v3011_v8  ;;  %v343_v8 = vpack.c.bf16 %v135_v2, %v119_v1  ;;  %v3037_v41 = vld [vmem:[#allocation5 + $0x3a8] sm:$0xff]   ;;  %v212_v2 = vld [vmem:[#allocation2 + $0x540] sm:$0xff] }
  0xaa   :  { %2733 = vmatpush3.bf16.msra.mxu1 %v3013_v13  ;;  %2782 = vmatprep.subr.bf16.mxu0 %v3014_v21  ;;  %v118_v13 = vld [vmem:[#allocation2 + $0x250] sm:$0xff]  ;;  %v3029_v21 = vld [vmem:[#allocation5 + $0x398] sm:$0xff]   ;;  %v57_v30 = vld [vmem:[#allocation2 + $0x68] sm:$0xff] }
  0xab   :  { %1718 = vmatmul.mubr.bf16.gmra.mrb[48].mxu0 %v368_v54  ;;  %2846 = vmatprep.subr.bf16.mxu1 %v3016_v24  ;;  %v84_v54 = vld [vmem:[#allocation2 + $0x140] sm:$0xff] }
  0xac   :  { %1815 = vmatmul.mubr.bf16.gmra.mrb[48].mxu1 %v370_v56  ;;  %1725 = vmatprep.mubr.bf16.mxu0 %v385_v57  ;;  %v3018_v56 = vld [vmem:[#allocation5 + $0x348] sm:$0xff]   ;;  %v86_v57 = vld [vmem:[#allocation2 + $0x150] sm:$0xff]  ;;  %v324_v4 = vpack.c.bf16 %v100_v55, %v84_v54  ;;  %v3032_v24 = vld [vmem:[#allocation5 + $0x3e0] sm:$0xff]  }
  0xad   :  { %1822 = vmatprep.mubr.bf16.mxu1 %v387_v59  ;;  %v102_v59 = vld [vmem:[#allocation2 + $0x1d0] sm:$0xff]  ;;  %v213_v54 = vld [vmem:[#allocation2 + $0x548] sm:$0xff] }
  0xae   :  { %v326_v5 = vpack.c.bf16 %v102_v59, %v86_v57  ;;  %v229_v55 = vld [vmem:[#allocation2 + $0x5c8] sm:$0xff]  ;;  %v215_v57 = vld [vmem:[#allocation2 + $0x558] sm:$0xff] }
  0xaf   :  { %v3043_v59 = vld [vmem:[#allocation5 + $0x338] sm:$0xff]  }
  0xb3   :  { %1726 = vmatmul.mubr.bf16.gmra.mrb[52].mxu0 %v384_v7  ;;  %v3023_v7 = vld [vmem:[#allocation5 + $0x310] sm:$0xff]  }
  0xb4   :  { %1823 = vmatmul.mubr.bf16.gmra.mrb[52].mxu1 %v386_v9  ;;  %1733 = vmatprep.mubr.bf16.mxu0 %v401_v10  ;;  %v3025_v9 = vld [vmem:[#allocation5 + $0x390] sm:$0xff]   ;;  %v116_v10 = vld [vmem:[#allocation2 + $0x240] sm:$0xff] }
  0xb5   :  { %1830 = vmatprep.mubr.bf16.mxu1 %v403_v12  ;;  %v3026_v12 = vld [vmem:[#allocation5 + $0x358] sm:$0xff]  }
  0xbb   :  { %1734 = vmatmul.mubr.bf16.gmra.mrb[56].mxu0 %v400_v23  ;;  %v340_v23 = vpack.c.bf16 %v132_v11, %v116_v10 }
  0xbc   :  { %1831 = vmatmul.mubr.bf16.gmra.mrb[56].mxu1 %v402_v25  ;;  %1741 = vmatprep.mubr.bf16.mxu0 %v417_v26  ;;  %v342_v25 = vpack.c.bf16 %v134_v14, %v118_v13  ;;  %v357_v26 = vpack.c.bf16 %v165_v17, %v149_v15  ;;  %v244_v14 = vld [vmem:[#allocation2 + $0x640] sm:$0xff]  ;;  %v262_v17 = vld [vmem:[#allocation2 + $0x6d0] sm:$0xff] }
  0xbd   :  { %1838 = vmatprep.mubr.bf16.mxu1 %v419_v27  ;;  %v359_v27 = vpack.c.bf16 %v167_v19, %v151_v18  ;;  %v260_v15 = vld [vmem:[#allocation2 + $0x6c0] sm:$0xff]  ;;  %v277_v18 = vld [vmem:[#allocation2 + $0x748] sm:$0xff] }
  0xbe   :  { %v293_v19 = vld [vmem:[#allocation2 + $0x7c8] sm:$0xff] }
  0xc3   :  { %1742 = vmatmul.mubr.bf16.gmra.mrb[60].mxu0 %v416_v36  ;;  %v197_v36 = vld [vmem:[#allocation2 + $0x4c8] sm:$0xff] }
  0xc4   :  { %1839 = vmatmul.mubr.bf16.gmra.mrb[60].mxu1 %v418_v37  ;;  %1879 = vmatprep.mubr.bf16.mxu0 %v309_v38  ;;  %v3036_v37 = vld [vmem:[#allocation5 + $0x3e8] sm:$0xff]   ;;  %v183_v38 = vld [vmem:[#allocation2 + $0x458] sm:$0xff] }
  0xc5   :  { %1976 = vmatprep.mubr.bf16.mxu1 %v311_v39  ;;  %v199_v39 = vld [vmem:[#allocation2 + $0x4d8] sm:$0xff] }
  0xc6   :  { %v375_v47 = vpack.c.bf16 %v199_v39, %v183_v38  ;;  %v56_v38 = vld [vmem:[#allocation2 + $0x60] sm:$0xff] }
  0xc7   :  { %v72_v39 = vld [vmem:[#allocation2 + $0xe0] sm:$0xff] }
  0xcb   :  { %1880 = vmatmul.mubr.bf16.vlgmr.msra.gmra.mrb[64].mxu0 %v308_v46  ;;  %v373_v46 = vpack.c.bf16 %v197_v36, %v181_v35 }
  0xcc   :  { %1977 = vmatmul.mubr.bf16.vlgmr.msra.gmra.mrb[64].mxu1 %v310_v49  ;;  %2783 = vmatpush3.bf16.msra.mxu0 %v3015_v50  ;;  %v180_v49 = vld [vmem:[#allocation2 + $0x440] sm:$0xff] }
  0xcd   :  { %2847 = vmatpush3.bf16.msra.mxu1 %v3017_v51  ;;  %1887 = vmatprep.mubr.bf16.mxu0 %v325_v52  ;;  %v196_v50 = vld [vmem:[#allocation2 + $0x4c0] sm:$0xff]  ;;  %v3041_v51 = vld [vmem:[#allocation5 + $0x3b0] sm:$0xff]  }
  0xce   :  { %1984 = vmatprep.mubr.bf16.mxu1 %v327_v53  ;;  %2784 = vmatprep.subr.bf16.mxu0 %v3018_v56  ;;  %v182_v52 = vld [vmem:[#allocation2 + $0x450] sm:$0xff]  ;;  %v3042_v56 = vld [vmem:[#allocation5 + $0x378] sm:$0xff]   ;;  %v372_v62 = vpack.c.bf16 %v196_v50, %v180_v49  ;;  %v88_v50 = vld [vmem:[#allocation2 + $0x160] sm:$0xff] }
  0xcf   :  { %2848 = vmatprep.subr.bf16.mxu1 %v3020_v58  ;;  %v198_v53 = vld [vmem:[#allocation2 + $0x4d0] sm:$0xff]  ;;  %v231_v58 = vld [vmem:[#allocation2 + $0x5d8] sm:$0xff] }
  0xd0   :  { %2785 = vmatpush3.bf16.msra.mxu0 %v3019_v60  ;;  %v3044_v60 = vld [vmem:[#allocation5 + $0x3f8] sm:$0xff]   ;;  %v374_v63 = vpack.c.bf16 %v198_v53, %v182_v52  ;;  %v391_v1 = vpack.c.bf16 %v231_v58, %v215_v57  ;;  %v90_v52 = vld [vmem:[#allocation2 + $0x170] sm:$0xff] }
  0xd1   :  { %2849 = vmatpush3.bf16.msra.mxu1 %v3021_v61  ;;  %2786 = vmatprep.subr.bf16.mxu0 %v3022_v0  ;;  %v3045_v61 = vld [vmem:[#allocation5 + $0x3b8] sm:$0xff]   ;;  %v389_v0 = vpack.c.bf16 %v229_v55, %v213_v54  ;;  %v106_v53 = vld [vmem:[#allocation2 + $0x1f0] sm:$0xff]  ;;  %v121_v54 = vld [vmem:[#allocation2 + $0x268] sm:$0xff] }
  0xd2   :  { %2850 = vmatprep.subr.bf16.mxu1 %v3024_v3  ;;  %v228_v3 = vld [vmem:[#allocation2 + $0x5c0] sm:$0xff]  ;;  %v137_v55 = vld [vmem:[#allocation2 + $0x2e8] sm:$0xff]  ;;  %v139_v57 = vld [vmem:[#allocation2 + $0x2f8] sm:$0xff] }
  0xd3   :  { %1888 = vmatmul.mubr.bf16.gmra.mrb[68].mxu0 %v324_v4  ;;  %v214_v4 = vld [vmem:[#allocation2 + $0x550] sm:$0xff]  ;;  %v388_v10 = vpack.c.bf16 %v228_v3, %v212_v2  ;;  %v153_v2 = vld [vmem:[#allocation2 + $0x368] sm:$0xff] }
  0xd4   :  { %1985 = vmatmul.mubr.bf16.gmra.mrb[68].mxu1 %v326_v5  ;;  %1895 = vmatprep.mubr.bf16.mxu0 %v341_v6  ;;  %v230_v5 = vld [vmem:[#allocation2 + $0x5d0] sm:$0xff]  ;;  %v245_v6 = vld [vmem:[#allocation2 + $0x648] sm:$0xff] }
  0xd5   :  { %1992 = vmatprep.mubr.bf16.mxu1 %v343_v8  ;;  %2787 = vmatpush3.bf16.msra.mxu0 %v3023_v7  ;;  %v261_v7 = vld [vmem:[#allocation2 + $0x6c8] sm:$0xff]  ;;  %v247_v8 = vld [vmem:[#allocation2 + $0x658] sm:$0xff]  ;;  %v390_v11 = vpack.c.bf16 %v230_v5, %v214_v4 }
  0xd6   :  { %2851 = vmatpush3.bf16.msra.mxu1 %v3025_v9  ;;  %2788 = vmatprep.subr.bf16.mxu0 %v3026_v12  ;;  %v263_v9 = vld [vmem:[#allocation2 + $0x6d8] sm:$0xff]  ;;  %v405_v12 = vpack.c.bf16 %v261_v7, %v245_v6  ;;  %v169_v3 = vld [vmem:[#allocation2 + $0x3e8] sm:$0xff] }
  0xd7   :  { %2852 = vmatprep.subr.bf16.mxu1 %v3028_v16  ;;  %v407_v13 = vpack.c.bf16 %v263_v9, %v247_v8  ;;  %v246_v16 = vld [vmem:[#allocation2 + $0x650] sm:$0xff]  ;;  %v155_v4 = vld [vmem:[#allocation2 + $0x378] sm:$0xff]  ;;  %v361_v8 = vpack.c.bf16 %v169_v3, %v153_v2  ;;  %v216_v2 = vld [vmem:[#allocation2 + $0x560] sm:$0xff] }
  0xd8   :  { %v171_v5 = vld [vmem:[#allocation2 + $0x3f8] sm:$0xff]  ;;  %v232_v3 = vld [vmem:[#allocation2 + $0x5e0] sm:$0xff] }
  0xd9   :  { %2789 = vmatpush3.bf16.msra.mxu0 %v3027_v20  ;;  %v279_v20 = vld [vmem:[#allocation2 + $0x758] sm:$0xff]  ;;  %v363_v9 = vpack.c.bf16 %v171_v5, %v155_v4  ;;  %v218_v4 = vld [vmem:[#allocation2 + $0x570] sm:$0xff] }
  0xda   :  { %2853 = vmatpush3.bf16.msra.mxu1 %v3029_v21  ;;  %2790 = vmatprep.subr.bf16.mxu0 %v3030_v22  ;;  %v295_v21 = vld [vmem:[#allocation2 + $0x7d8] sm:$0xff]  ;;  %v404_v22 = vpack.c.bf16 %v260_v15, %v244_v14  ;;  %v185_v14 = vld [vmem:[#allocation2 + $0x468] sm:$0xff]  ;;  %v234_v5 = vld [vmem:[#allocation2 + $0x5f0] sm:$0xff] }
  0xdb   :  { %1896 = vmatmul.mubr.bf16.gmra.mrb[72].mxu0 %v340_v23  ;;  %2854 = vmatprep.subr.bf16.mxu1 %v3032_v24  ;;  %v406_v23 = vpack.c.bf16 %v262_v17, %v246_v16  ;;  %v421_v24 = vpack.c.bf16 %v293_v19, %v277_v18  ;;  %v201_v15 = vld [vmem:[#allocation2 + $0x4e8] sm:$0xff]  ;;  %v187_v17 = vld [vmem:[#allocation2 + $0x478] sm:$0xff] }
  0xdc   :  { %1993 = vmatmul.mubr.bf16.gmra.mrb[72].mxu1 %v342_v25  ;;  %1903 = vmatprep.mubr.bf16.mxu0 %v357_v26  ;;  %v423_v25 = vpack.c.bf16 %v295_v21, %v279_v20  ;;  %v276_v26 = vld [vmem:[#allocation2 + $0x740] sm:$0xff]  ;;  %v203_v18 = vld [vmem:[#allocation2 + $0x4f8] sm:$0xff] }
  0xdd   :  { %2000 = vmatprep.mubr.bf16.mxu1 %v359_v27  ;;  %2791 = vmatpush3.bf16.msra.mxu0 %v3031_v28  ;;  %v292_v27 = vld [vmem:[#allocation2 + $0x7c0] sm:$0xff]  ;;  %v278_v28 = vld [vmem:[#allocation2 + $0x750] sm:$0xff] }
  0xde   :  { %2855 = vmatpush3.bf16.msra.mxu1 %v3033_v31  ;;  %2792 = vmatprep.subr.bf16.mxu0 %v3034_v32  ;;  %v73_v31 = vld [vmem:[#allocation2 + $0xe8] sm:$0xff]  ;;  %v59_v32 = vld [vmem:[#allocation2 + $0x78] sm:$0xff]  ;;  %v420_v34 = vpack.c.bf16 %v292_v27, %v276_v26  ;;  %v422_v35 = vpack.c.bf16 %v294_v29, %v278_v28  ;;  %v3174_v20 = vld [vmem:[%s3352_s2] ss:$0 sm:$0xff]  ;;  %v377_v27 = vpack.c.bf16 %v201_v15, %v185_v14 }
  0xdf   :  { %2856 = vmatprep.subr.bf16.mxu1 %v3036_v37  ;;  %v313_v36 = vpack.c.bf16 %v73_v31, %v57_v30  ;;  %v315_v37 = vpack.c.bf16 %v75_v33, %v59_v32  ;;  %v379_v31 = vpack.c.bf16 %v203_v18, %v187_v17  ;;  %v392_v14 = vpack.c.bf16 %v232_v3, %v216_v2 }
  0xe0   :  { %v394_v18 = vpack.c.bf16 %v234_v5, %v218_v4 }
  0xe1   :  { %2793 = vmatpush3.bf16.msra.mxu0 %v3035_v40  ;;  %v58_v40 = vld [vmem:[#allocation2 + $0x70] sm:$0xff] }
  0xe2   :  { %2857 = vmatpush3.bf16.msra.mxu1 %v3037_v41  ;;  %2794 = vmatprep.subr.bf16.mxu0 %v3038_v42  ;;  %v74_v41 = vld [vmem:[#allocation2 + $0xf0] sm:$0xff]  ;;  %v89_v42 = vld [vmem:[#allocation2 + $0x168] sm:$0xff] }
  0xe3   :  { %1904 = vmatmul.mubr.bf16.gmra.mrb[76].mxu0 %v356_v43  ;;  %2858 = vmatprep.subr.bf16.mxu1 %v3040_v44  ;;  %v105_v43 = vld [vmem:[#allocation2 + $0x1e8] sm:$0xff]  ;;  %v91_v44 = vld [vmem:[#allocation2 + $0x178] sm:$0xff] }
  0xe4   :  { %2001 = vmatmul.mubr.bf16.gmra.mrb[76].mxu1 %v358_v45  ;;  %1911 = vmatprep.mubr.bf16.mxu0 %v373_v46  ;;  %v107_v45 = vld [vmem:[#allocation2 + $0x1f8] sm:$0xff]  ;;  %v312_v46 = vpack.c.bf16 %v72_v39, %v56_v38  ;;  %v184_v38 = vld [vmem:[#allocation2 + $0x460] sm:$0xff] }
  0xe5   :  { %2008 = vmatprep.mubr.bf16.mxu1 %v375_v47  ;;  %2795 = vmatpush3.bf16.msra.mxu0 %v3039_v48  ;;  %v314_v47 = vpack.c.bf16 %v74_v41, %v58_v40  ;;  %v329_v48 = vpack.c.bf16 %v105_v43, %v89_v42  ;;  %v331_v49 = vpack.c.bf16 %v107_v45, %v91_v44  ;;  %v200_v39 = vld [vmem:[#allocation2 + $0x4e0] sm:$0xff]  ;;  %v186_v40 = vld [vmem:[#allocation2 + $0x470] sm:$0xff]  ;;  %v217_v42 = vld [vmem:[#allocation2 + $0x568] sm:$0xff] }
  0xe6   :  { %2859 = vmatpush3.bf16.msra.mxu1 %v3041_v51  ;;  %2796 = vmatprep.subr.bf16.mxu0 %v3042_v56  ;;  %v104_v51 = vld [vmem:[#allocation2 + $0x1e0] sm:$0xff]  ;;  %v123_v56 = vld [vmem:[#allocation2 + $0x278] sm:$0xff]  ;;  %v202_v41 = vld [vmem:[#allocation2 + $0x4f0] sm:$0xff] }
  0xe7   :  { %2860 = vmatprep.subr.bf16.mxu1 %v3044_v60  ;;  %v328_v58 = vpack.c.bf16 %v104_v51, %v88_v50  ;;  %v345_v60 = vpack.c.bf16 %v137_v55, %v121_v54  ;;  %v233_v43 = vld [vmem:[#allocation2 + $0x5e8] sm:$0xff]  ;;  %v376_v50 = vpack.c.bf16 %v200_v39, %v184_v38  ;;  %v378_v54 = vpack.c.bf16 %v202_v41, %v186_v40  ;;  %v283_v40 = vld [vmem:[#allocation2 + $0x778] sm:$0xff] }
  0xe8   :  { %v393_v55 = vpack.c.bf16 %v233_v43, %v217_v42  ;;  %v299_v41 = vld [vmem:[#allocation2 + $0x7f8] sm:$0xff] }
  0xe9   :  { %2797 = vmatpush3.bf16.msra.mxu0 %v3043_v59  ;;  %v330_v59 = vpack.c.bf16 %v106_v53, %v90_v52 }
  0xea   :  { %2861 = vmatpush3.bf16.msra.mxu1 %v3045_v61  ;;  %v347_v61 = vpack.c.bf16 %v139_v57, %v123_v56 }
  0xeb   :  { %1912 = vmatmul.mubr.bf16.gmra.mrb[80].mxu0 %v372_v62  ;;  %v120_v62 = vld [vmem:[#allocation2 + $0x260] sm:$0xff] }
  0xec   :  { %2009 = vmatmul.mubr.bf16.gmra.mrb[80].mxu1 %v374_v63  ;;  %1919 = vmatprep.mubr.bf16.mxu0 %v389_v0  ;;  %v136_v63 = vld [vmem:[#allocation2 + $0x2e0] sm:$0xff]  ;;  %v122_v0 = vld [vmem:[#allocation2 + $0x270] sm:$0xff] }
  0xed   :  { %2016 = vmatprep.mubr.bf16.mxu1 %v391_v1  ;;  %v138_v1 = vld [vmem:[#allocation2 + $0x2f0] sm:$0xff]  ;;  %v344_v6 = vpack.c.bf16 %v136_v63, %v120_v62 }
  0xee   :  { %v346_v7 = vpack.c.bf16 %v138_v1, %v122_v0 }
  0xf3   :  { %1920 = vmatmul.mubr.bf16.gmra.mrb[84].mxu0 %v388_v10  ;;  %v152_v10 = vld [vmem:[#allocation2 + $0x360] sm:$0xff] }
  0xf4   :  { %2017 = vmatmul.mubr.bf16.gmra.mrb[84].mxu1 %v390_v11  ;;  %1927 = vmatprep.mubr.bf16.mxu0 %v405_v12  ;;  %v168_v11 = vld [vmem:[#allocation2 + $0x3e0] sm:$0xff]  ;;  %v154_v12 = vld [vmem:[#allocation2 + $0x370] sm:$0xff] }
  0xf5   :  { %2024 = vmatprep.mubr.bf16.mxu1 %v407_v13  ;;  %v170_v13 = vld [vmem:[#allocation2 + $0x3f0] sm:$0xff] }
  0xf6   :  { %v362_v26 = vpack.c.bf16 %v170_v13, %v154_v12 }
  0xfb   :  { %1928 = vmatmul.mubr.bf16.gmra.mrb[88].mxu0 %v404_v22  ;;  %v360_v22 = vpack.c.bf16 %v168_v11, %v152_v10  ;;  %v251_v10 = vld [vmem:[#allocation2 + $0x678] sm:$0xff] }
  0xfc   :  { %2025 = vmatmul.mubr.bf16.gmra.mrb[88].mxu1 %v406_v23  ;;  %1935 = vmatprep.mubr.bf16.mxu0 %v421_v24  ;;  %v267_v11 = vld [vmem:[#allocation2 + $0x6f8] sm:$0xff] }
  0xfd   :  { %2032 = vmatprep.mubr.bf16.mxu1 %v423_v25 }
 0x103   :  { %1936 = vmatmul.mubr.bf16.gmra.mrb[92].mxu0 %v420_v34 }
 0x104   :  { %2033 = vmatmul.mubr.bf16.gmra.mrb[92].mxu1 %v422_v35  ;;  %2073 = vmatprep.mubr.bf16.mxu0 %v313_v36 }
 0x105   :  { %2170 = vmatprep.mubr.bf16.mxu1 %v315_v37 }
 0x10b   :  { %2074 = vmatmul.mubr.bf16.vlgmr.msra.gmra.mrb[96].mxu0 %v312_v46  ;;  %v219_v46 = vld [vmem:[#allocation2 + $0x578] sm:$0xff] }
 0x10c   :  { %2171 = vmatmul.mubr.bf16.vlgmr.msra.gmra.mrb[96].mxu1 %v314_v47  ;;  %2081 = vmatprep.mubr.bf16.mxu0 %v329_v48  ;;  %v235_v47 = vld [vmem:[#allocation2 + $0x5f8] sm:$0xff] }
 0x10d   :  { %2178 = vmatprep.mubr.bf16.mxu1 %v331_v49 }
 0x113   :  { %2082 = vmatmul.mubr.bf16.gmra.mrb[100].mxu0 %v328_v58 }
 0x114   :  { %2179 = vmatmul.mubr.bf16.gmra.mrb[100].mxu1 %v330_v59  ;;  %2089 = vmatprep.mubr.bf16.mxu0 %v345_v60  ;;  %v395_v59 = vpack.c.bf16 %v235_v47, %v219_v46 }
 0x115   :  { %2186 = vmatprep.mubr.bf16.mxu1 %v347_v61 }
 0x11b   :  { %2090 = vmatmul.mubr.bf16.gmra.mrb[104].mxu0 %v344_v6  ;;  %v249_v6 = vld [vmem:[#allocation2 + $0x668] sm:$0xff] }
 0x11c   :  { %2187 = vmatmul.mubr.bf16.gmra.mrb[104].mxu1 %v346_v7  ;;  %2097 = vmatprep.mubr.bf16.mxu0 %v361_v8  ;;  %v265_v7 = vld [vmem:[#allocation2 + $0x6e8] sm:$0xff] }
 0x11d   :  { %2194 = vmatprep.mubr.bf16.mxu1 %v363_v9 }
 0x11e   :  { %v2414_v16 = vpop.f32.mrb[0].mxu0 }
 0x11f   :  { %v2478_v19 = vpop.f32.mrb[0].mxu1  ;;  %v2415_v21 = vpop.f32.mrb[1].mxu0 }
 0x120   :  { %v2416_v23 = vadd.f32 %v2415_v21, %v2414_v16  ;;  %v2479_v24 = vpop.f32.mrb[1].mxu1  ;;  %v2417_v25 = vpop.f32.mrb[2].mxu0 }
 0x121   :  { %v2480_v28 = vadd.f32 %v2479_v24, %v2478_v19  ;;  %v2481_v29 = vpop.f32.mrb[2].mxu1  ;;  %v2418_v30 = vpop.f32.mrb[3].mxu0  ;;  %v409_v19 = vpack.c.bf16 %v265_v7, %v249_v6  ;;  %v411_v24 = vpack.c.bf16 %v267_v11, %v251_v10 }
 0x122   :  { %v1494_v32 = vadd.f32 %v2416_v23, %v3174_v20  ;;  %v2419_v33 = vadd.f32 %v2418_v30, %v2417_v25  ;;  %v2482_v34 = vpop.f32.mrb[3].mxu1 }
 0x123   :  { %v2483_v35 = vadd.f32 %v2482_v34, %v2481_v29  ;;  %2098 = vmatmul.mubr.bf16.gmra.mrb[108].mxu0 %v360_v22  ;;  %v266_v34 = vld [vmem:[#allocation2 + $0x6f0] sm:$0xff] }
 0x124   :  { %v3177_v36 = vadd.f32 %v2480_v28, %v1494_v32  ;;  %v1497_v37 = vadd.f32 %v2419_v33, %v3174_v20  ;;  %2195 = vmatmul.mubr.bf16.gmra.mrb[108].mxu1 %v362_v26  ;;  %2105 = vmatprep.mubr.bf16.mxu0 %v377_v27  ;;  %v264_v32 = vld [vmem:[#allocation2 + $0x6e0] sm:$0xff]  ;;  %v250_v33 = vld [vmem:[#allocation2 + $0x670] sm:$0xff] }
 0x125   :  { %2202 = vmatprep.mubr.bf16.mxu1 %v379_v31  ;;  %v248_v31 = vld [vmem:[#allocation2 + $0x660] sm:$0xff] }
 0x126   :  { %v3180_v44 = vadd.f32 %v2483_v35, %v1497_v37  ;;  %v2420_v45 = vpop.f32.mrb[4].mxu0  ;;  %v281_v35 = vld [vmem:[#allocation2 + $0x768] sm:$0xff] }
 0x127   :  { %v2484_v48 = vpop.f32.mrb[4].mxu1  ;;  %v2421_v49 = vpop.f32.mrb[5].mxu0  ;;  %v297_v37 = vld [vmem:[#allocation2 + $0x7e8] sm:$0xff] }
 0x128   :  { %v2422_v51 = vadd.f32 %v2421_v49, %v2420_v45  ;;  %v2485_v52 = vpop.f32.mrb[5].mxu1  ;;  %v2423_v53 = vpop.f32.mrb[6].mxu0  ;;  %v408_v45 = vpack.c.bf16 %v264_v32, %v248_v31  ;;  %v410_v49 = vpack.c.bf16 %v266_v34, %v250_v33 }
 0x129   :  { %v2486_v56 = vadd.f32 %v2485_v52, %v2484_v48  ;;  %v2487_v57 = vpop.f32.mrb[6].mxu1  ;;  %v2424_v58 = vpop.f32.mrb[7].mxu0 }
 0x12a   :  { %v1502_v60 = vadd.f32 %v2422_v51, %v3174_v20  ;;  %v2425_v61 = vadd.f32 %v2424_v58, %v2423_v53  ;;  %v2488_v62 = vpop.f32.mrb[7].mxu1 }
 0x12b   :  { %v2489_v63 = vadd.f32 %v2488_v62, %v2487_v57  ;;  %2106 = vmatmul.mubr.bf16.gmra.mrb[112].mxu0 %v376_v50  ;;  %v425_v50 = vpack.c.bf16 %v297_v37, %v281_v35  ;;  %v296_v62 = vld [vmem:[#allocation2 + $0x7e0] sm:$0xff] }
 0x12c   :  { %v3183_v0 = vadd.f32 %v2486_v56, %v1502_v60  ;;  %v1505_v1 = vadd.f32 %v2425_v61, %v3174_v20  ;;  %2203 = vmatmul.mubr.bf16.gmra.mrb[112].mxu1 %v378_v54  ;;  %2113 = vmatprep.mubr.bf16.mxu0 %v393_v55  ;;  %v427_v54 = vpack.c.bf16 %v299_v41, %v283_v40  ;;  %v280_v61 = vld [vmem:[#allocation2 + $0x760] sm:$0xff] }
 0x12d   :  { %2210 = vmatprep.mubr.bf16.mxu1 %v395_v59  ;;  %v424_v6 = vpack.c.bf16 %v296_v62, %v280_v61 }
 0x12e   :  { %v3186_v8 = vadd.f32 %v2489_v63, %v1505_v1  ;;  %v2426_v9 = vpop.f32.mrb[8].mxu0  ;;  %v282_v63 = vld [vmem:[#allocation2 + $0x770] sm:$0xff] }
 0x12f   :  { %v2490_v12 = vpop.f32.mrb[8].mxu1  ;;  %v2427_v13 = vpop.f32.mrb[9].mxu0  ;;  %v298_v1 = vld [vmem:[#allocation2 + $0x7f0] sm:$0xff] }
 0x130   :  { %v2428_v15 = vadd.f32 %v2427_v13, %v2426_v9  ;;  %v2491_v16 = vpop.f32.mrb[9].mxu1  ;;  %v2429_v17 = vpop.f32.mrb[10].mxu0  ;;  %v426_v11 = vpack.c.bf16 %v298_v1, %v282_v63 }
 0x131   :  { %v2492_v21 = vadd.f32 %v2491_v16, %v2490_v12  ;;  %v2493_v22 = vpop.f32.mrb[10].mxu1  ;;  %v2430_v23 = vpop.f32.mrb[11].mxu0 }
 0x132   :  { %v1510_v25 = vadd.f32 %v2428_v15, %v3174_v20  ;;  %v2431_v26 = vadd.f32 %v2430_v23, %v2429_v17  ;;  %v2494_v27 = vpop.f32.mrb[11].mxu1 }
 0x133   :  { %v2495_v28 = vadd.f32 %v2494_v27, %v2493_v22  ;;  %2114 = vmatmul.mubr.bf16.gmra.mrb[116].mxu0 %v392_v14 }
 0x134   :  { %v3189_v29 = vadd.f32 %v2492_v21, %v1510_v25  ;;  %v1513_v30 = vadd.f32 %v2431_v26, %v3174_v20  ;;  %2211 = vmatmul.mubr.bf16.gmra.mrb[116].mxu1 %v394_v18  ;;  %2121 = vmatprep.mubr.bf16.mxu0 %v409_v19 }
 0x135   :  { %2218 = vmatprep.mubr.bf16.mxu1 %v411_v24 }
 0x136   :  { %v3192_v38 = vadd.f32 %v2495_v28, %v1513_v30  ;;  %v2432_v39 = vpop.f32.mrb[12].mxu0 }
 0x137   :  { %v2496_v42 = vpop.f32.mrb[12].mxu1  ;;  %v2433_v43 = vpop.f32.mrb[13].mxu0 }
 0x138   :  { %v2434_v46 = vadd.f32 %v2433_v43, %v2432_v39  ;;  %v2497_v47 = vpop.f32.mrb[13].mxu1  ;;  %v2435_v48 = vpop.f32.mrb[14].mxu0 }
 0x139   :  { %v2498_v51 = vadd.f32 %v2497_v47, %v2496_v42  ;;  %v2499_v52 = vpop.f32.mrb[14].mxu1  ;;  %v2436_v53 = vpop.f32.mrb[15].mxu0 }
 0x13a   :  { %v1518_v55 = vadd.f32 %v2434_v46, %v3174_v20  ;;  %v2437_v56 = vadd.f32 %v2436_v53, %v2435_v48  ;;  %v2500_v57 = vpop.f32.mrb[15].mxu1 }
 0x13b   :  { %v2501_v58 = vadd.f32 %v2500_v57, %v2499_v52  ;;  %2122 = vmatmul.mubr.bf16.gmra.mrb[120].mxu0 %v408_v45 }
 0x13c   :  { %v3195_v59 = vadd.f32 %v2498_v51, %v1518_v55  ;;  %v1521_v60 = vadd.f32 %v2437_v56, %v3174_v20  ;;  %2219 = vmatmul.mubr.bf16.gmra.mrb[120].mxu1 %v410_v49  ;;  %2129 = vmatprep.mubr.bf16.mxu0 %v425_v50 }
 0x13d   :  { %2226 = vmatprep.mubr.bf16.mxu1 %v427_v54 }
 0x13e   :  { %v3198_v2 = vadd.f32 %v2501_v58, %v1521_v60  ;;  %v2438_v3 = vpop.f32.mrb[16].mxu0 }
 0x13f   :  { %v2502_v4 = vpop.f32.mrb[16].mxu1  ;;  %v2439_v5 = vpop.f32.mrb[17].mxu0 }
 0x140   :  { %v2440_v7 = vadd.f32 %v2439_v5, %v2438_v3  ;;  %v2503_v9 = vpop.f32.mrb[17].mxu1  ;;  %v2441_v10 = vpop.f32.mrb[18].mxu0 }
 0x141   :  { %v2504_v12 = vadd.f32 %v2503_v9, %v2502_v4  ;;  %v2505_v13 = vpop.f32.mrb[18].mxu1  ;;  %v2442_v14 = vpop.f32.mrb[19].mxu0 }
 0x142   :  { %v1526_v15 = vadd.f32 %v2440_v7, %v3174_v20  ;;  %v2443_v16 = vadd.f32 %v2442_v14, %v2441_v10  ;;  %v2506_v17 = vpop.f32.mrb[19].mxu1 }
 0x143   :  { %v2507_v18 = vadd.f32 %v2506_v17, %v2505_v13  ;;  %2130 = vmatmul.mubr.bf16.gmra.mrb[124].mxu0 %v424_v6 }
 0x144   :  { %v3201_v19 = vadd.f32 %v2504_v12, %v1526_v15  ;;  %v1529_v21 = vadd.f32 %v2443_v16, %v3174_v20  ;;  %2227 = vmatmul.mubr.bf16.gmra.mrb[124].mxu1 %v426_v11 }
 0x146   :  { %v3204_v22 = vadd.f32 %v2507_v18, %v1529_v21  ;;  %v2444_v23 = vpop.f32.mrb[20].mxu0 }
 0x147   :  { %v2508_v24 = vpop.f32.mrb[20].mxu1  ;;  %v2445_v25 = vpop.f32.mrb[21].mxu0 }
 0x148   :  { %v2446_v26 = vadd.f32 %v2445_v25, %v2444_v23  ;;  %v2509_v27 = vpop.f32.mrb[21].mxu1  ;;  %v2447_v28 = vpop.f32.mrb[22].mxu0 }
 0x149   :  { %v2510_v30 = vadd.f32 %v2509_v27, %v2508_v24  ;;  %v2511_v31 = vpop.f32.mrb[22].mxu1  ;;  %v2448_v32 = vpop.f32.mrb[23].mxu0 }
 0x14a   :  { %v1534_v33 = vadd.f32 %v2446_v26, %v3174_v20  ;;  %v2449_v34 = vadd.f32 %v2448_v32, %v2447_v28  ;;  %v2512_v35 = vpop.f32.mrb[23].mxu1 }
 0x14b   :  { %v2513_v37 = vadd.f32 %v2512_v35, %v2511_v31 }
 0x14c   :  { %v3207_v39 = vadd.f32 %v2510_v30, %v1534_v33  ;;  %v1537_v40 = vadd.f32 %v2449_v34, %v3174_v20 }
 0x14e   :  { %v3210_v41 = vadd.f32 %v2513_v37, %v1537_v40  ;;  %v2450_v42 = vpop.f32.mrb[24].mxu0 }
 0x14f   :  { %v2514_v43 = vpop.f32.mrb[24].mxu1  ;;  %v2451_v45 = vpop.f32.mrb[25].mxu0 }
 0x150   :  { %v2452_v46 = vadd.f32 %v2451_v45, %v2450_v42  ;;  %v2515_v47 = vpop.f32.mrb[25].mxu1  ;;  %v2453_v48 = vpop.f32.mrb[26].mxu0 }
 0x151   :  { %v2516_v49 = vadd.f32 %v2515_v47, %v2514_v43  ;;  %v2517_v50 = vpop.f32.mrb[26].mxu1  ;;  %v2454_v51 = vpop.f32.mrb[27].mxu0 }
 0x152   :  { %v1542_v52 = vadd.f32 %v2452_v46, %v3174_v20  ;;  %v2455_v53 = vadd.f32 %v2454_v51, %v2453_v48  ;;  %v2518_v54 = vpop.f32.mrb[27].mxu1 }
 0x153   :  { %v2519_v55 = vadd.f32 %v2518_v54, %v2517_v50 }
 0x154   :  { %v3213_v56 = vadd.f32 %v2516_v49, %v1542_v52  ;;  %v1545_v57 = vadd.f32 %v2455_v53, %v3174_v20 }
 0x156   :  { %v3216_v58 = vadd.f32 %v2519_v55, %v1545_v57  ;;  %v2456_v60 = vpop.f32.mrb[28].mxu0 }
 0x157   :  { %v2520_v61 = vpop.f32.mrb[28].mxu1  ;;  %v2457_v62 = vpop.f32.mrb[29].mxu0 }
 0x158   :  { %v2458_v63 = vadd.f32 %v2457_v62, %v2456_v60  ;;  %v2521_v1 = vpop.f32.mrb[29].mxu1  ;;  %v2459_v3 = vpop.f32.mrb[30].mxu0 }
 0x159   :  { %v2522_v4 = vadd.f32 %v2521_v1, %v2520_v61  ;;  %v2523_v5 = vpop.f32.mrb[30].mxu1  ;;  %v2460_v6 = vpop.f32.mrb[31].mxu0 }
 0x15a   :  { %v1550_v7 = vadd.f32 %v2458_v63, %v3174_v20  ;;  %v2461_v9 = vadd.f32 %v2460_v6, %v2459_v3  ;;  %v2524_v10 = vpop.f32.mrb[31].mxu1 }
 0x15b   :  { %v2525_v11 = vadd.f32 %v2524_v10, %v2523_v5 }
 0x15c   :  { %v3219_v12 = vadd.f32 %v2522_v4, %v1550_v7  ;;  %v1553_v13 = vadd.f32 %v2461_v9, %v3174_v20 }
 0x15e   :  { %v3222_v14 = vadd.f32 %v2525_v11, %v1553_v13  ;;  %v2542_v15 = vpop.f32.mrb[32].mxu0 }
 0x15f   :  { %v2606_v16 = vpop.f32.mrb[32].mxu1  ;;  %v2543_v17 = vpop.f32.mrb[33].mxu0 }
 0x160   :  { %v2544_v18 = vadd.f32 %v2543_v17, %v2542_v15  ;;  %v2607_v21 = vpop.f32.mrb[33].mxu1  ;;  %v2545_v23 = vpop.f32.mrb[34].mxu0 }
 0x161   :  { %v2608_v24 = vadd.f32 %v2607_v21, %v2606_v16  ;;  %v2609_v25 = vpop.f32.mrb[34].mxu1  ;;  %v2546_v26 = vpop.f32.mrb[35].mxu0 }
 0x162   :  { %v1688_v27 = vadd.f32 %v2544_v18, %v3177_v36  ;;  %v2547_v28 = vadd.f32 %v2546_v26, %v2545_v23  ;;  %v2610_v30 = vpop.f32.mrb[35].mxu1 }
 0x163   :  { %v2611_v31 = vadd.f32 %v2610_v30, %v2609_v25 }
 0x164   :  { %v3225_v32 = vadd.f32 %v2608_v24, %v1688_v27  ;;  %v1691_v20 = vadd.f32 %v2547_v28, %v3180_v44 }
 0x166   :  { %v3228_v33 = vadd.f32 %v2611_v31, %v1691_v20  ;;  %v2548_v34 = vpop.f32.mrb[36].mxu0 }
 0x167   :  { %v2612_v35 = vpop.f32.mrb[36].mxu1  ;;  %v2549_v37 = vpop.f32.mrb[37].mxu0 }
 0x168   :  { %v2550_v40 = vadd.f32 %v2549_v37, %v2548_v34  ;;  %v2613_v42 = vpop.f32.mrb[37].mxu1  ;;  %v2551_v43 = vpop.f32.mrb[38].mxu0 }
 0x169   :  { %v2614_v45 = vadd.f32 %v2613_v42, %v2612_v35  ;;  %v2615_v46 = vpop.f32.mrb[38].mxu1  ;;  %v2552_v47 = vpop.f32.mrb[39].mxu0 }
 0x16a   :  { %v1696_v36 = vadd.f32 %v2550_v40, %v3183_v0  ;;  %v2553_v48 = vadd.f32 %v2552_v47, %v2551_v43  ;;  %v2616_v49 = vpop.f32.mrb[39].mxu1 }
 0x16b   :  { %v2617_v50 = vadd.f32 %v2616_v49, %v2615_v46 }
 0x16c   :  { %v3231_v51 = vadd.f32 %v2614_v45, %v1696_v36  ;;  %v1699_v44 = vadd.f32 %v2553_v48, %v3186_v8 }
 0x16e   :  { %v3234_v52 = vadd.f32 %v2617_v50, %v1699_v44  ;;  %v2554_v53 = vpop.f32.mrb[40].mxu0 }
 0x16f   :  { %v2618_v54 = vpop.f32.mrb[40].mxu1  ;;  %v2555_v55 = vpop.f32.mrb[41].mxu0 }
 0x170   :  { %v2556_v57 = vadd.f32 %v2555_v55, %v2554_v53  ;;  %v2619_v60 = vpop.f32.mrb[41].mxu1  ;;  %v2557_v61 = vpop.f32.mrb[42].mxu0 }
 0x171   :  { %v2620_v62 = vadd.f32 %v2619_v60, %v2618_v54  ;;  %v2621_v63 = vpop.f32.mrb[42].mxu1  ;;  %v2558_v1 = vpop.f32.mrb[43].mxu0 }
 0x172   :  { %v1704_v0 = vadd.f32 %v2556_v57, %v3189_v29  ;;  %v2559_v3 = vadd.f32 %v2558_v1, %v2557_v61  ;;  %v2622_v4 = vpop.f32.mrb[43].mxu1 }
 0x173   :  { %v2623_v5 = vadd.f32 %v2622_v4, %v2621_v63 }
 0x174   :  { %v3237_v6 = vadd.f32 %v2620_v62, %v1704_v0  ;;  %v1707_v8 = vadd.f32 %v2559_v3, %v3192_v38 }
 0x176   :  { %v3240_v7 = vadd.f32 %v2623_v5, %v1707_v8  ;;  %v2560_v9 = vpop.f32.mrb[44].mxu0 }
 0x177   :  { %v2624_v10 = vpop.f32.mrb[44].mxu1  ;;  %v2561_v11 = vpop.f32.mrb[45].mxu0 }
 0x178   :  { %v2562_v13 = vadd.f32 %v2561_v11, %v2560_v9  ;;  %v2625_v15 = vpop.f32.mrb[45].mxu1  ;;  %v2563_v16 = vpop.f32.mrb[46].mxu0 }
 0x179   :  { %v2626_v17 = vadd.f32 %v2625_v15, %v2624_v10  ;;  %v2627_v18 = vpop.f32.mrb[46].mxu1  ;;  %v2564_v21 = vpop.f32.mrb[47].mxu0 }
 0x17a   :  { %v1712_v29 = vadd.f32 %v2562_v13, %v3195_v59  ;;  %v2565_v23 = vadd.f32 %v2564_v21, %v2563_v16  ;;  %v2628_v24 = vpop.f32.mrb[47].mxu1 }
 0x17b   :  { %v2629_v25 = vadd.f32 %v2628_v24, %v2627_v18 }
 0x17c   :  { %v3243_v26 = vadd.f32 %v2626_v17, %v1712_v29  ;;  %v1715_v38 = vadd.f32 %v2565_v23, %v3198_v2 }
 0x17e   :  { %v3246_v27 = vadd.f32 %v2629_v25, %v1715_v38  ;;  %v2566_v28 = vpop.f32.mrb[48].mxu0 }
 0x17f   :  { %v2630_v30 = vpop.f32.mrb[48].mxu1  ;;  %v2567_v31 = vpop.f32.mrb[49].mxu0 }
 0x180   :  { %v2568_v20 = vadd.f32 %v2567_v31, %v2566_v28  ;;  %v2631_v34 = vpop.f32.mrb[49].mxu1  ;;  %v2569_v35 = vpop.f32.mrb[50].mxu0 }
 0x181   :  { %v2632_v37 = vadd.f32 %v2631_v34, %v2630_v30  ;;  %v2633_v40 = vpop.f32.mrb[50].mxu1  ;;  %v2570_v42 = vpop.f32.mrb[51].mxu0 }
 0x182   :  { %v1720_v59 = vadd.f32 %v2568_v20, %v3201_v19  ;;  %v2571_v43 = vadd.f32 %v2570_v42, %v2569_v35  ;;  %v2634_v45 = vpop.f32.mrb[51].mxu1 }
 0x183   :  { %v2635_v46 = vadd.f32 %v2634_v45, %v2633_v40 }
 0x184   :  { %v3249_v47 = vadd.f32 %v2632_v37, %v1720_v59  ;;  %v1723_v2 = vadd.f32 %v2571_v43, %v3204_v22 }
 0x186   :  { %v3252_v36 = vadd.f32 %v2635_v46, %v1723_v2  ;;  %v2572_v48 = vpop.f32.mrb[52].mxu0 }
 0x187   :  { %v2636_v49 = vpop.f32.mrb[52].mxu1  ;;  %v2573_v50 = vpop.f32.mrb[53].mxu0 }
 0x188   :  { %v2574_v44 = vadd.f32 %v2573_v50, %v2572_v48  ;;  %v2637_v53 = vpop.f32.mrb[53].mxu1  ;;  %v2575_v54 = vpop.f32.mrb[54].mxu0 }
 0x189   :  { %v2638_v55 = vadd.f32 %v2637_v53, %v2636_v49  ;;  %v2639_v57 = vpop.f32.mrb[54].mxu1  ;;  %v2576_v60 = vpop.f32.mrb[55].mxu0 }
 0x18a   :  { %v1728_v19 = vadd.f32 %v2574_v44, %v3207_v39  ;;  %v2577_v61 = vadd.f32 %v2576_v60, %v2575_v54  ;;  %v2640_v62 = vpop.f32.mrb[55].mxu1 }
 0x18b   :  { %v2641_v63 = vadd.f32 %v2640_v62, %v2639_v57 }
 0x18c   :  { %v3255_v1 = vadd.f32 %v2638_v55, %v1728_v19  ;;  %v1731_v22 = vadd.f32 %v2577_v61, %v3210_v41 }
 0x18e   :  { %v3258_v0 = vadd.f32 %v2641_v63, %v1731_v22  ;;  %v2578_v3 = vpop.f32.mrb[56].mxu0 }
 0x18f   :  { %v2642_v4 = vpop.f32.mrb[56].mxu1  ;;  %v2579_v5 = vpop.f32.mrb[57].mxu0 }
 0x190   :  { %v2580_v8 = vadd.f32 %v2579_v5, %v2578_v3  ;;  %v2643_v9 = vpop.f32.mrb[57].mxu1  ;;  %v2581_v10 = vpop.f32.mrb[58].mxu0 }
 0x191   :  { %v2644_v11 = vadd.f32 %v2643_v9, %v2642_v4  ;;  %v2645_v13 = vpop.f32.mrb[58].mxu1  ;;  %v2582_v15 = vpop.f32.mrb[59].mxu0 }
 0x192   :  { %v1736_v39 = vadd.f32 %v2580_v8, %v3213_v56  ;;  %v2583_v16 = vadd.f32 %v2582_v15, %v2581_v10  ;;  %v2646_v17 = vpop.f32.mrb[59].mxu1 }
 0x193   :  { %v2647_v18 = vadd.f32 %v2646_v17, %v2645_v13 }
 0x194   :  { %v3261_v21 = vadd.f32 %v2644_v11, %v1736_v39  ;;  %v1739_v41 = vadd.f32 %v2583_v16, %v3216_v58 }
 0x196   :  { %v3264_v29 = vadd.f32 %v2647_v18, %v1739_v41  ;;  %v2584_v23 = vpop.f32.mrb[60].mxu0 }
 0x197   :  { %v2648_v24 = vpop.f32.mrb[60].mxu1  ;;  %v2585_v25 = vpop.f32.mrb[61].mxu0 }
 0x198   :  { %v2586_v38 = vadd.f32 %v2585_v25, %v2584_v23  ;;  %v2649_v28 = vpop.f32.mrb[61].mxu1  ;;  %v2587_v30 = vpop.f32.mrb[62].mxu0 }
 0x199   :  { %v2650_v31 = vadd.f32 %v2649_v28, %v2648_v24  ;;  %v2651_v20 = vpop.f32.mrb[62].mxu1  ;;  %v2588_v34 = vpop.f32.mrb[63].mxu0 }
 0x19a   :  { %v1744_v56 = vadd.f32 %v2586_v38, %v3219_v12  ;;  %v2589_v35 = vadd.f32 %v2588_v34, %v2587_v30  ;;  %v2652_v37 = vpop.f32.mrb[63].mxu1 }
 0x19b   :  { %v2653_v40 = vadd.f32 %v2652_v37, %v2651_v20 }
 0x19c   :  { %v3267_v42 = vadd.f32 %v2650_v31, %v1744_v56  ;;  %v1747_v58 = vadd.f32 %v2589_v35, %v3222_v14 }
 0x19e   :  { %v3270_v59 = vadd.f32 %v2653_v40, %v1747_v58  ;;  %v2670_v43 = vpop.f32.mrb[64].mxu0 }
 0x19f   :  { %v2734_v45 = vpop.f32.mrb[64].mxu1  ;;  %v2671_v46 = vpop.f32.mrb[65].mxu0 }
 0x1a0   :  { %v2672_v2 = vadd.f32 %v2671_v46, %v2670_v43  ;;  %v2735_v48 = vpop.f32.mrb[65].mxu1  ;;  %v2673_v49 = vpop.f32.mrb[66].mxu0 }
 0x1a1   :  { %v2736_v50 = vadd.f32 %v2735_v48, %v2734_v45  ;;  %v2737_v44 = vpop.f32.mrb[66].mxu1  ;;  %v2674_v53 = vpop.f32.mrb[67].mxu0 }
 0x1a2   :  { %v1882_v12 = vadd.f32 %v2672_v2, %v3225_v32  ;;  %v2675_v54 = vadd.f32 %v2674_v53, %v2673_v49  ;;  %v2738_v55 = vpop.f32.mrb[67].mxu1 }
 0x1a3   :  { %v2739_v57 = vadd.f32 %v2738_v55, %v2737_v44 }
 0x1a4   :  { %v3273_v60 = vadd.f32 %v2736_v50, %v1882_v12  ;;  %v1885_v14 = vadd.f32 %v2675_v54, %v3228_v33 }
 0x1a6   :  { %v3276_v19 = vadd.f32 %v2739_v57, %v1885_v14  ;;  %v2676_v61 = vpop.f32.mrb[68].mxu0 }
 0x1a7   :  { %v2740_v62 = vpop.f32.mrb[68].mxu1  ;;  %v2677_v63 = vpop.f32.mrb[69].mxu0 }
 0x1a8   :  { %v2678_v22 = vadd.f32 %v2677_v63, %v2676_v61  ;;  %v2741_v3 = vpop.f32.mrb[69].mxu1  ;;  %v2679_v4 = vpop.f32.mrb[70].mxu0 }
 0x1a9   :  { %v2742_v5 = vadd.f32 %v2741_v3, %v2740_v62  ;;  %v2743_v8 = vpop.f32.mrb[70].mxu1  ;;  %v2680_v9 = vpop.f32.mrb[71].mxu0 }
 0x1aa   :  { %v1890_v32 = vadd.f32 %v2678_v22, %v3231_v51  ;;  %v2681_v10 = vadd.f32 %v2680_v9, %v2679_v4  ;;  %v2744_v11 = vpop.f32.mrb[71].mxu1 }
 0x1ab   :  { %v2745_v13 = vadd.f32 %v2744_v11, %v2743_v8 }
 0x1ac   :  { %v3279_v15 = vadd.f32 %v2742_v5, %v1890_v32  ;;  %v1893_v33 = vadd.f32 %v2681_v10, %v3234_v52 }
 0x1ae   :  { %v3282_v39 = vadd.f32 %v2745_v13, %v1893_v33  ;;  %v2682_v16 = vpop.f32.mrb[72].mxu0 }
 0x1af   :  { %v2746_v17 = vpop.f32.mrb[72].mxu1  ;;  %v2683_v18 = vpop.f32.mrb[73].mxu0 }
 0x1b0   :  { %v2684_v41 = vadd.f32 %v2683_v18, %v2682_v16  ;;  %v2747_v23 = vpop.f32.mrb[73].mxu1  ;;  %v2685_v24 = vpop.f32.mrb[74].mxu0 }
 0x1b1   :  { %v2748_v25 = vadd.f32 %v2747_v23, %v2746_v17  ;;  %v2749_v38 = vpop.f32.mrb[74].mxu1  ;;  %v2686_v28 = vpop.f32.mrb[75].mxu0 }
 0x1b2   :  { %v1898_v51 = vadd.f32 %v2684_v41, %v3237_v6  ;;  %v2687_v30 = vadd.f32 %v2686_v28, %v2685_v24  ;;  %v2750_v31 = vpop.f32.mrb[75].mxu1 }
 0x1b3   :  { %v2751_v20 = vadd.f32 %v2750_v31, %v2749_v38 }
 0x1b4   :  { %v3285_v34 = vadd.f32 %v2748_v25, %v1898_v51  ;;  %v1901_v52 = vadd.f32 %v2687_v30, %v3240_v7 }
 0x1b6   :  { %v3288_v56 = vadd.f32 %v2751_v20, %v1901_v52  ;;  %v2688_v35 = vpop.f32.mrb[76].mxu0 }
 0x1b7   :  { %v2752_v37 = vpop.f32.mrb[76].mxu1  ;;  %v2689_v40 = vpop.f32.mrb[77].mxu0 }
 0x1b8   :  { %v2690_v58 = vadd.f32 %v2689_v40, %v2688_v35  ;;  %v2753_v43 = vpop.f32.mrb[77].mxu1  ;;  %v2691_v45 = vpop.f32.mrb[78].mxu0 }
 0x1b9   :  { %v2754_v46 = vadd.f32 %v2753_v43, %v2752_v37  ;;  %v2755_v2 = vpop.f32.mrb[78].mxu1  ;;  %v2692_v48 = vpop.f32.mrb[79].mxu0 }
 0x1ba   :  { %v1906_v6 = vadd.f32 %v2690_v58, %v3243_v26  ;;  %v2693_v49 = vadd.f32 %v2692_v48, %v2691_v45  ;;  %v2756_v50 = vpop.f32.mrb[79].mxu1 }
 0x1bb   :  { %v2757_v44 = vadd.f32 %v2756_v50, %v2755_v2 }
 0x1bc   :  { %v3291_v53 = vadd.f32 %v2754_v46, %v1906_v6  ;;  %v1909_v7 = vadd.f32 %v2693_v49, %v3246_v27 }
 0x1be   :  { %v3294_v12 = vadd.f32 %v2757_v44, %v1909_v7  ;;  %v2694_v54 = vpop.f32.mrb[80].mxu0 }
 0x1bf   :  { %v2758_v55 = vpop.f32.mrb[80].mxu1  ;;  %v2695_v57 = vpop.f32.mrb[81].mxu0 }
 0x1c0   :  { %v2696_v14 = vadd.f32 %v2695_v57, %v2694_v54  ;;  %v2759_v61 = vpop.f32.mrb[81].mxu1  ;;  %v2697_v62 = vpop.f32.mrb[82].mxu0 }
 0x1c1   :  { %v2760_v63 = vadd.f32 %v2759_v61, %v2758_v55  ;;  %v2761_v22 = vpop.f32.mrb[82].mxu1  ;;  %v2698_v3 = vpop.f32.mrb[83].mxu0 }
 0x1c2   :  { %v1914_v26 = vadd.f32 %v2696_v14, %v3249_v47  ;;  %v2699_v4 = vadd.f32 %v2698_v3, %v2697_v62  ;;  %v2762_v5 = vpop.f32.mrb[83].mxu1 }
 0x1c3   :  { %v2763_v8 = vadd.f32 %v2762_v5, %v2761_v22 }
 0x1c4   :  { %v3297_v9 = vadd.f32 %v2760_v63, %v1914_v26  ;;  %v1917_v27 = vadd.f32 %v2699_v4, %v3252_v36 }
 0x1c6   :  { %v3300_v32 = vadd.f32 %v2763_v8, %v1917_v27  ;;  %v2700_v10 = vpop.f32.mrb[84].mxu0 }
 0x1c7   :  { %v2764_v11 = vpop.f32.mrb[84].mxu1  ;;  %v2701_v13 = vpop.f32.mrb[85].mxu0 }
 0x1c8   :  { %v2702_v33 = vadd.f32 %v2701_v13, %v2700_v10  ;;  %v2765_v16 = vpop.f32.mrb[85].mxu1  ;;  %v2703_v17 = vpop.f32.mrb[86].mxu0 }
 0x1c9   :  { %v2766_v18 = vadd.f32 %v2765_v16, %v2764_v11  ;;  %v2767_v41 = vpop.f32.mrb[86].mxu1  ;;  %v2704_v23 = vpop.f32.mrb[87].mxu0 }
 0x1ca   :  { %v1922_v47 = vadd.f32 %v2702_v33, %v3255_v1  ;;  %v2705_v24 = vadd.f32 %v2704_v23, %v2703_v17  ;;  %v2768_v25 = vpop.f32.mrb[87].mxu1 }
 0x1cb   :  { %v2769_v38 = vadd.f32 %v2768_v25, %v2767_v41 }
 0x1cc   :  { %v3303_v28 = vadd.f32 %v2766_v18, %v1922_v47  ;;  %v1925_v36 = vadd.f32 %v2705_v24, %v3258_v0 }
 0x1ce   :  { %v3306_v51 = vadd.f32 %v2769_v38, %v1925_v36  ;;  %v2706_v30 = vpop.f32.mrb[88].mxu0 }
 0x1cf   :  { %v2770_v31 = vpop.f32.mrb[88].mxu1  ;;  %v2707_v20 = vpop.f32.mrb[89].mxu0 }
 0x1d0   :  { %v2708_v52 = vadd.f32 %v2707_v20, %v2706_v30  ;;  %v2771_v35 = vpop.f32.mrb[89].mxu1  ;;  %v2709_v37 = vpop.f32.mrb[90].mxu0 }
 0x1d1   :  { %v2772_v40 = vadd.f32 %v2771_v35, %v2770_v31  ;;  %v2773_v58 = vpop.f32.mrb[90].mxu1  ;;  %v2710_v43 = vpop.f32.mrb[91].mxu0 }
 0x1d2   :  { %v1930_v1 = vadd.f32 %v2708_v52, %v3261_v21  ;;  %v2711_v45 = vadd.f32 %v2710_v43, %v2709_v37  ;;  %v2774_v46 = vpop.f32.mrb[91].mxu1 }
 0x1d3   :  { %v2775_v2 = vadd.f32 %v2774_v46, %v2773_v58 }
 0x1d4   :  { %v3309_v48 = vadd.f32 %v2772_v40, %v1930_v1  ;;  %v1933_v0 = vadd.f32 %v2711_v45, %v3264_v29 }
 0x1d6   :  { %v3312_v6 = vadd.f32 %v2775_v2, %v1933_v0  ;;  %v2712_v49 = vpop.f32.mrb[92].mxu0 }
 0x1d7   :  { %v2776_v50 = vpop.f32.mrb[92].mxu1  ;;  %v2713_v44 = vpop.f32.mrb[93].mxu0 }
 0x1d8   :  { %v2714_v7 = vadd.f32 %v2713_v44, %v2712_v49  ;;  %v2777_v54 = vpop.f32.mrb[93].mxu1  ;;  %v2715_v55 = vpop.f32.mrb[94].mxu0 }
 0x1d9   :  { %v2778_v57 = vadd.f32 %v2777_v54, %v2776_v50  ;;  %v2779_v14 = vpop.f32.mrb[94].mxu1  ;;  %v2716_v61 = vpop.f32.mrb[95].mxu0 }
 0x1da   :  { %v1938_v21 = vadd.f32 %v2714_v7, %v3267_v42  ;;  %v2717_v62 = vadd.f32 %v2716_v61, %v2715_v55  ;;  %v2780_v63 = vpop.f32.mrb[95].mxu1 }
 0x1db   :  { %v2781_v22 = vadd.f32 %v2780_v63, %v2779_v14 }
 0x1dc   :  { %v3315_v3 = vadd.f32 %v2778_v57, %v1938_v21  ;;  %v1941_v29 = vadd.f32 %v2717_v62, %v3270_v59 }
 0x1de   :  { %v3318_v26 = vadd.f32 %v2781_v22, %v1941_v29  ;;  %v2798_v4 = vpop.f32.mrb[96].mxu0 }
 0x1df   :  { %v2862_v5 = vpop.f32.mrb[96].mxu1  ;;  %v2799_v8 = vpop.f32.mrb[97].mxu0 }
 0x1e0   :  { %v2800_v27 = vadd.f32 %v2799_v8, %v2798_v4  ;;  %v2863_v10 = vpop.f32.mrb[97].mxu1  ;;  %v2801_v11 = vpop.f32.mrb[98].mxu0 }
 0x1e1   :  { %v2864_v13 = vadd.f32 %v2863_v10, %v2862_v5  ;;  %v2865_v33 = vpop.f32.mrb[98].mxu1  ;;  %v2802_v16 = vpop.f32.mrb[99].mxu0 }
 0x1e2   :  { %v2076_v42 = vadd.f32 %v2800_v27, %v3273_v60  ;;  %v2803_v17 = vadd.f32 %v2802_v16, %v2801_v11  ;;  %v2866_v18 = vpop.f32.mrb[99].mxu1 }
 0x1e3   :  { %v2867_v41 = vadd.f32 %v2866_v18, %v2865_v33 }
 0x1e4   :  { %v2173_v23 = vadd.f32 %v2864_v13, %v2076_v42  ;;  %v2079_v47 = vadd.f32 %v2803_v17, %v3276_v19 }
 0x1e6   :  { %2235 = vst [vmem:[#allocation7] sm:$0xff] %v2173_v23  ;;  %v2176_v59 = vadd.f32 %v2867_v41, %v2079_v47  ;;  %v2804_v24 = vpop.f32.mrb[100].mxu0 }
 0x1e7   :  { %v2868_v25 = vpop.f32.mrb[100].mxu1  ;;  %v2805_v38 = vpop.f32.mrb[101].mxu0 }
 0x1e8   :  { %2236 = vst [vmem:[#allocation7 + $0x8] sm:$0xff] %v2176_v59  ;;  %v2806_v36 = vadd.f32 %v2805_v38, %v2804_v24  ;;  %v2869_v30 = vpop.f32.mrb[101].mxu1  ;;  %v2807_v31 = vpop.f32.mrb[102].mxu0 }
 0x1e9   :  { %v2870_v20 = vadd.f32 %v2869_v30, %v2868_v25  ;;  %v2871_v52 = vpop.f32.mrb[102].mxu1  ;;  %v2808_v35 = vpop.f32.mrb[103].mxu0 }
 0x1ea   :  { %v2084_v60 = vadd.f32 %v2806_v36, %v3279_v15  ;;  %v2809_v37 = vadd.f32 %v2808_v35, %v2807_v31  ;;  %v2872_v40 = vpop.f32.mrb[103].mxu1 }
 0x1eb   :  { %v2873_v58 = vadd.f32 %v2872_v40, %v2871_v52 }
 0x1ec   :  { %v2181_v43 = vadd.f32 %v2870_v20, %v2084_v60  ;;  %v2087_v19 = vadd.f32 %v2809_v37, %v3282_v39 }
 0x1ee   :  { %2237 = vst [vmem:[#allocation7 + $0x10] sm:$0xff] %v2181_v43  ;;  %v2184_v1 = vadd.f32 %v2873_v58, %v2087_v19  ;;  %v2810_v45 = vpop.f32.mrb[104].mxu0 }
 0x1ef   :  { %v2874_v46 = vpop.f32.mrb[104].mxu1  ;;  %v2811_v2 = vpop.f32.mrb[105].mxu0 }
 0x1f0   :  { %2238 = vst [vmem:[#allocation7 + $0x18] sm:$0xff] %v2184_v1  ;;  %v2812_v0 = vadd.f32 %v2811_v2, %v2810_v45  ;;  %v2875_v49 = vpop.f32.mrb[105].mxu1  ;;  %v2813_v50 = vpop.f32.mrb[106].mxu0 }
 0x1f1   :  { %v2876_v44 = vadd.f32 %v2875_v49, %v2874_v46  ;;  %v2877_v7 = vpop.f32.mrb[106].mxu1  ;;  %v2814_v54 = vpop.f32.mrb[107].mxu0 }
 0x1f2   :  { %v2092_v15 = vadd.f32 %v2812_v0, %v3285_v34  ;;  %v2815_v55 = vadd.f32 %v2814_v54, %v2813_v50  ;;  %v2878_v57 = vpop.f32.mrb[107].mxu1 }
 0x1f3   :  { %v2879_v14 = vadd.f32 %v2878_v57, %v2877_v7 }
 0x1f4   :  { %v2189_v61 = vadd.f32 %v2876_v44, %v2092_v15  ;;  %v2095_v39 = vadd.f32 %v2815_v55, %v3288_v56 }
 0x1f6   :  { %2239 = vst [vmem:[#allocation7 + $0x20] sm:$0xff] %v2189_v61  ;;  %v2192_v21 = vadd.f32 %v2879_v14, %v2095_v39  ;;  %v2816_v62 = vpop.f32.mrb[108].mxu0 }
 0x1f7   :  { %v2880_v63 = vpop.f32.mrb[108].mxu1  ;;  %v2817_v22 = vpop.f32.mrb[109].mxu0 }
 0x1f8   :  { %2240 = vst [vmem:[#allocation7 + $0x28] sm:$0xff] %v2192_v21  ;;  %v2818_v29 = vadd.f32 %v2817_v22, %v2816_v62  ;;  %v2881_v4 = vpop.f32.mrb[109].mxu1  ;;  %v2819_v5 = vpop.f32.mrb[110].mxu0 }
 0x1f9   :  { %v2882_v8 = vadd.f32 %v2881_v4, %v2880_v63  ;;  %v2883_v27 = vpop.f32.mrb[110].mxu1  ;;  %v2820_v10 = vpop.f32.mrb[111].mxu0 }
 0x1fa   :  { %v2100_v34 = vadd.f32 %v2818_v29, %v3291_v53  ;;  %v2821_v11 = vadd.f32 %v2820_v10, %v2819_v5  ;;  %v2884_v13 = vpop.f32.mrb[111].mxu1 }
 0x1fb   :  { %v2885_v33 = vadd.f32 %v2884_v13, %v2883_v27 }
 0x1fc   :  { %v2197_v16 = vadd.f32 %v2882_v8, %v2100_v34  ;;  %v2103_v56 = vadd.f32 %v2821_v11, %v3294_v12 }
 0x1fe   :  { %2241 = vst [vmem:[#allocation7 + $0x30] sm:$0xff] %v2197_v16  ;;  %v2200_v42 = vadd.f32 %v2885_v33, %v2103_v56  ;;  %v2822_v17 = vpop.f32.mrb[112].mxu0 }
 0x1ff   :  { %v2886_v18 = vpop.f32.mrb[112].mxu1  ;;  %v2823_v41 = vpop.f32.mrb[113].mxu0 }
 0x200   :  { %2242 = vst [vmem:[#allocation7 + $0x38] sm:$0xff] %v2200_v42  ;;  %v2824_v23 = vadd.f32 %v2823_v41, %v2822_v17  ;;  %v2887_v47 = vpop.f32.mrb[113].mxu1  ;;  %v2825_v59 = vpop.f32.mrb[114].mxu0 }
 0x201   :  { %v2888_v24 = vadd.f32 %v2887_v47, %v2886_v18  ;;  %v2889_v25 = vpop.f32.mrb[114].mxu1  ;;  %v2826_v38 = vpop.f32.mrb[115].mxu0 }
 0x202   :  { %v2108_v53 = vadd.f32 %v2824_v23, %v3297_v9  ;;  %v2827_v36 = vadd.f32 %v2826_v38, %v2825_v59  ;;  %v2890_v30 = vpop.f32.mrb[115].mxu1 }
 0x203   :  { %v2891_v31 = vadd.f32 %v2890_v30, %v2889_v25 }
 0x204   :  { %v2205_v20 = vadd.f32 %v2888_v24, %v2108_v53  ;;  %v2111_v12 = vadd.f32 %v2827_v36, %v3300_v32 }
 0x206   :  { %2243 = vst [vmem:[#allocation7 + $0x40] sm:$0xff] %v2205_v20  ;;  %v2208_v52 = vadd.f32 %v2891_v31, %v2111_v12  ;;  %v2828_v35 = vpop.f32.mrb[116].mxu0 }
 0x207   :  { %v2892_v60 = vpop.f32.mrb[116].mxu1  ;;  %v2829_v37 = vpop.f32.mrb[117].mxu0 }
 0x208   :  { %2244 = vst [vmem:[#allocation7 + $0x48] sm:$0xff] %v2208_v52  ;;  %v2830_v40 = vadd.f32 %v2829_v37, %v2828_v35  ;;  %v2893_v58 = vpop.f32.mrb[117].mxu1  ;;  %v2831_v43 = vpop.f32.mrb[118].mxu0 }
 0x209   :  { %v2894_v19 = vadd.f32 %v2893_v58, %v2892_v60  ;;  %v2895_v1 = vpop.f32.mrb[118].mxu1  ;;  %v2832_v45 = vpop.f32.mrb[119].mxu0 }
 0x20a   :  { %v2116_v9 = vadd.f32 %v2830_v40, %v3303_v28  ;;  %v2833_v46 = vadd.f32 %v2832_v45, %v2831_v43  ;;  %v2896_v2 = vpop.f32.mrb[119].mxu1 }
 0x20b   :  { %v2897_v0 = vadd.f32 %v2896_v2, %v2895_v1 }
 0x20c   :  { %v2213_v49 = vadd.f32 %v2894_v19, %v2116_v9  ;;  %v2119_v32 = vadd.f32 %v2833_v46, %v3306_v51 }
 0x20e   :  { %2245 = vst [vmem:[#allocation7 + $0x50] sm:$0xff] %v2213_v49  ;;  %v2216_v50 = vadd.f32 %v2897_v0, %v2119_v32  ;;  %v2834_v44 = vpop.f32.mrb[120].mxu0 }
 0x20f   :  { %v2898_v7 = vpop.f32.mrb[120].mxu1  ;;  %v2835_v54 = vpop.f32.mrb[121].mxu0 }
 0x210   :  { %2246 = vst [vmem:[#allocation7 + $0x58] sm:$0xff] %v2216_v50  ;;  %v2836_v15 = vadd.f32 %v2835_v54, %v2834_v44  ;;  %v2899_v55 = vpop.f32.mrb[121].mxu1  ;;  %v2837_v57 = vpop.f32.mrb[122].mxu0 }
 0x211   :  { %v2900_v14 = vadd.f32 %v2899_v55, %v2898_v7  ;;  %v2901_v61 = vpop.f32.mrb[122].mxu1  ;;  %v2838_v39 = vpop.f32.mrb[123].mxu0 }
 0x212   :  { %v2124_v28 = vadd.f32 %v2836_v15, %v3309_v48  ;;  %v2839_v21 = vadd.f32 %v2838_v39, %v2837_v57  ;;  %v2902_v62 = vpop.f32.mrb[123].mxu1 }
 0x213   :  { %v2903_v63 = vadd.f32 %v2902_v62, %v2901_v61 }
 0x214   :  { %v2221_v22 = vadd.f32 %v2900_v14, %v2124_v28  ;;  %v2127_v51 = vadd.f32 %v2839_v21, %v3312_v6 }
 0x216   :  { %2247 = vst [vmem:[#allocation7 + $0x60] sm:$0xff] %v2221_v22  ;;  %v2224_v29 = vadd.f32 %v2903_v63, %v2127_v51  ;;  %v2840_v4 = vpop.f32.mrb[124].mxu0 }
 0x217   :  { %v2904_v5 = vpop.f32.mrb[124].mxu1  ;;  %v2841_v8 = vpop.f32.mrb[125].mxu0 }
 0x218   :  { %2248 = vst [vmem:[#allocation7 + $0x68] sm:$0xff] %v2224_v29  ;;  %v2842_v27 = vadd.f32 %v2841_v8, %v2840_v4  ;;  %v2905_v10 = vpop.f32.mrb[125].mxu1  ;;  %v2843_v34 = vpop.f32.mrb[126].mxu0 }
 0x219   :  { %v2906_v11 = vadd.f32 %v2905_v10, %v2904_v5  ;;  %v2907_v13 = vpop.f32.mrb[126].mxu1  ;;  %v2844_v33 = vpop.f32.mrb[127].mxu0 }
 0x21a   :  { %v2132_v48 = vadd.f32 %v2842_v27, %v3315_v3  ;;  %v2845_v16 = vadd.f32 %v2844_v33, %v2843_v34  ;;  %v2908_v56 = vpop.f32.mrb[127].mxu1 }
 0x21b   :  { %v2909_v42 = vadd.f32 %v2908_v56, %v2907_v13 }
 0x21c   :  { %v2229_v17 = vadd.f32 %v2906_v11, %v2132_v48  ;;  %v2135_v6 = vadd.f32 %v2845_v16, %v3318_v26 }
 0x21e   :  { %2249 = vst [vmem:[#allocation7 + $0x70] sm:$0xff] %v2229_v17  ;;  %v2232_v18 = vadd.f32 %v2909_v42, %v2135_v6 }
 0x220   :  { %2250 = vst [vmem:[#allocation7 + $0x78] sm:$0xff] %v2232_v18 }
 0x221   :  { %2255 = vsyncadd [#allocation4], 1792  ;;  %s3124_s2 = smov [#allocation7]  }
 0x222   :  { %s2256_s14 = sshll.u32 %s3124_s2, 4  ;;  %s2257_s14 = int_to_ptr.vmem [resolvable:$true] %s2256_s14 }
 0x223   :  { %s3090_s15 = scalar_lea.vmem %s2257_s14, 256  ;;  %s3094_s16 = scalar_lea.vmem %s2257_s14, 2048 }
 0x224   :  { %p3091_p2 = scmp.ne.s32.totalorder %s2257_s14, %s3090_s15  ;;  %p3095_p3 = scmp.lt.s32.totalorder %s2257_s14, %s2257_s14 }
 0x225   :  { %p3096_p4 = scmp.lt.s32.totalorder %s3094_s16, %s3090_s15 }
 0x227   :  { %p3097_p5 = por %p3096_p4, %p3095_p3 }
 0x229   :  { %p3098_p6 = pnand %p3097_p5, %p3091_p2 }
 0x22b   :  { %3101 = shalt.err (!%p3098_p6)
}
 0x22c   :  { %s3102_s19 = scalar_lea.hbm %s3353_s3, 256 }
 0x22d   :  { %p3103_p7 = scmp.ne.s32.totalorder %s3353_s3, %s3102_s19  ;;  %p3106_p8 = scmp.lt.u32.totalorder %s3102_s19, %s3353_s3 }
 0x22f   :  { %p3108_p9 = pnand %p3106_p8, %p3103_p7 }
 0x231   :  { %3111 = shalt.err (!%p3108_p9)
}
 0x232   :  { %s3125_s25 = smov 8  }
 0x233   :  { %2262 = dma.vmem_to_hbm [thread:$0]  %s2257_s14, 256, %s3353_s3, [#allocation4], %s3120_s24, %s3120_s24, %s3125_s25  }
 0x234   :  { %3116 = dma.done.wait [#allocation4], 2048  }
 0x235   :  { %3117 = vsyncadd [#allocation4], 4294965248 }
 0x236   :  { %2266 = vsyncpa [#allocation3], 1 }
 0x237   :  { %2267 = vsyncpa [#allocation6], 1 }
 0x238   :  { %2268 = vsyncpa [#allocation4], 1 }

</bundles_post_ra>
